<compile_context>
chip_gen: v6e
topology: v6e:2x2x1
jax: 0.10.0
libtpu: 0.0.40
codegen_flags: <defaults>
</compile_context>

<pallas_src>
import functools

import jax
import jax.numpy as jnp
from jax.experimental import pallas as pl
from jax.experimental.pallas import tpu as pltpu


def _round_up(x, m):
    return ((x + m - 1) // m) * m


def _bertcnn_kernel(h1_ref, h2_ref, h3_ref, wf_ref, bf_ref,
                    wo_cls_ref, wo_conv_ref, bo_ref, out_ref, *, s_real):
    tb, SP, HP = h1_ref.shape          # SP = seq padded to x8, HP = hidden padded to x128
    KH, CF = wf_ref.shape              # KH = 7*HP (tap-major im2col weight), CF = padded 3*Cout
    KW = KH // HP                      # 7 fused taps
    PAD = KW // 2

    # torch.mean(torch.stack([h[-1], h[-2], h[-3]]), dim=0) -- f32 accumulation.
    seq = (h1_ref[...].astype(jnp.float32)
           + h2_ref[...].astype(jnp.float32)
           + h3_ref[...].astype(jnp.float32)) * (1.0 / 3.0)          # (tb,SP,HP)

    cls = seq[:, 0, :]                                               # (tb,HP)

    # Valid token positions are 1..s_real-1 (0 = CLS, >= s_real = wrapper pad).
    pos = jax.lax.broadcasted_iota(jnp.int32, (tb, SP, 1), 1)
    valid = jnp.logical_and(pos > 0, pos < s_real)

    # Mask + cast to bf16 ONCE; this single copy feeds every tap.
    x = jnp.where(valid, seq, 0.0).astype(jnp.bfloat16)              # (tb,SP,HP)
    zpad = jnp.zeros((tb, PAD, HP), jnp.bfloat16)
    xp = jnp.concatenate([zpad, x, zpad], axis=1)                    # (tb,SP+6,HP)

    # im2col: concat the 7 shifted windows along the 128-aligned lane axis and
    # do ONE big-K MXU matmul (K = 7*HP) with f32 accumulation; keep the
    # accumulator flat and reshape exactly once after the dot.
    xc = jnp.concatenate([xp[:, k:k + SP, :] for k in range(KW)], axis=-1)
    acc = jnp.dot(xc.reshape(tb * SP, KH), wf_ref[...],
                  preferred_element_type=jnp.float32)                # (tb*SP, CF)
    acc = (acc + bf_ref[...]).reshape(tb, SP, CF)

    # Fused ReLU + position mask: post-ReLU values are >= 0, so writing 0 at
    # the CLS / padded positions can never change the max.
    conv_feat = jnp.where(valid, jnp.maximum(acc, 0.0), 0.0)
    pooled = jnp.max(conv_feat, axis=1)                              # (tb, CF)

    # Final Linear on [cls | pooled]: bf16 operands, f32 accumulation; padded
    # channels / labels carry zero weights and bias.
    logits = (jnp.dot(cls.astype(jnp.bfloat16), wo_cls_ref[...],
                      preferred_element_type=jnp.float32)
              + jnp.dot(pooled.astype(jnp.bfloat16), wo_conv_ref[...],
                        preferred_element_type=jnp.float32)
              + bo_ref[...])
    probs = 1.0 / (1.0 + jnp.exp(-logits))                           # sigmoid
    out_ref[...] = jnp.clip(probs, 1e-7, 1.0 - 1e-7)[:, None, :]


def _prep_params(params, HP):
    """Fuse the three conv weights into one tap-major im2col weight (7*HP, CF),
    lane-pad everything, and cast the matmul weights to bf16 (one-time)."""
    w3 = params["w3"]
    H, cout = w3.shape[1], w3.shape[2]
    NL = params["wo"].shape[1]
    CF = _round_up(3 * cout, 128)          # fused conv out-channels, lane-dense
    NLP = _round_up(NL, 128)               # padded label dim, lane-dense
    KW = 7

    wf = jnp.zeros((KW, HP, CF), jnp.float32)
    bf = jnp.zeros((1, CF), jnp.float32)
    for idx, k in enumerate((3, 5, 7)):
        w = params[f"w{k}"]                # (k, H, cout) == PyTorch (cout,H,k) transposed
        b = params[f"b{k}"]                # (1, cout)
        off = (KW - k) // 2                # center-align taps in the 7-wide window
        col = idx * cout
        wf = wf.at[off:off + k, :H, col:col + cout].set(w)
        bf = bf.at[:, col:col + cout].set(b)
    wf = wf.reshape(KW * HP, CF).astype(jnp.bfloat16)   # rows match im2col lane order

    wo, bo = params["wo"], params["bo"]    # (H + 3*cout, NL), (1, NL)
    wo_cls = (jnp.zeros((HP, NLP), jnp.float32)
              .at[:H, :NL].set(wo[:H]).astype(jnp.bfloat16))
    wo_conv = (jnp.zeros((CF, NLP), jnp.float32)
               .at[:3 * cout, :NL].set(wo[H:]).astype(jnp.bfloat16))
    bo_p = jnp.zeros((1, NLP), jnp.float32).at[:, :NL].set(bo)
    return wf, bf, wo_cls, wo_conv, bo_p, CF, NLP, NL


def _vmem_limit_bytes():
    try:
        cap = int(pltpu.get_tpu_info().vmem_capacity_bytes)   # 64 MiB v7x, 128 MiB v5e/v6e
    except Exception:
        cap = 64 * 1024 * 1024
    return min((cap * 4) // 5, 100 * 1024 * 1024)


def _pick_batch_tile(B, SP, HP, CF, NLP, vmem_limit):
    """Batch tile sized from the REAL live set (inputs + f32/bf16 intermediates
    + im2col + resident weights), capped so the grid has >= min(B, 8) steps."""
    # Resident weights, counted at 2 pipeline buffers (conservative even when
    # single-buffered via pl.Buffered(1)).
    w_bytes = 2 * (7 * HP * CF * 2 + HP * NLP * 2 + CF * NLP * 2 + CF * 4 + NLP * 4)
    # Per batch element: 3 double-buffered bf16 inputs (12 B/elem of SP*HP),
    # f32 mean (4), masked bf16 copy (2), padded copy (~2), im2col (14),
    # f32 conv accumulator + relu/mask temp (8 B/elem of SP*CF), output bufs.
    per_elem = SP * HP * (12 + 4 + 2 + 2 + 14) + SP * CF * 8 + 2 * NLP * 4
    budget = int(vmem_limit * 0.9) - w_bytes
    cap_vmem = max(1, budget // per_elem)
    # >= min(B, 8) grid steps: keeps both v7x TensorCores busy and gives the
    # BlockSpec pipeline enough iterations to hide the HBM streaming.
    cap_steps = max(1, B // min(B, 8))
    cap = int(min(cap_vmem, cap_steps, B))
    divs = [d for d in range(1, cap + 1) if B % d == 0]
    m8 = [d for d in divs if d % 8 == 0]
    return (m8 or divs)[-1]


def bertcnn_forward(h1, h2, h3, params):
    B, S, H = h1.shape
    SP = _round_up(max(S, 8), 8)       # 8-aligned sublane dim
    HP = _round_up(H, 128)             # 128-aligned lane dim (im2col offsets aligned)
    wf, bf, wo_cls, wo_conv, bo, CF, NLP, NL = _prep_params(params, HP)

    # Stream the (only large) activations as bf16 (memory-bound kernel); pad
    # seq / hidden dims with zeros (masked / zero-weighted inside the kernel).
    def prep(h):
        return jnp.pad(h.astype(jnp.bfloat16), ((0, 0), (0, SP - S), (0, HP - H)))
    h1b, h2b, h3b = prep(h1), prep(h2), prep(h3)

    vmem_limit = _vmem_limit_bytes()
    tb = _pick_batch_tile(B, SP, HP, CF, NLP, vmem_limit)
    grid = (B // tb,)

    kernel = functools.partial(_bertcnn_kernel, s_real=S)

    def build(single_buffer_weights):
        def wspec(shape):
            nd = len(shape)
            idx = lambda i: (0,) * nd
            if single_buffer_weights:
                # Constant index_map => re-fetch never needed; single-buffer
                # the resident weights to free VMEM for a bigger batch tile.
                return pl.BlockSpec(shape, idx, pipeline_mode=pl.Buffered(1))
            return pl.BlockSpec(shape, idx)

        return pl.pallas_call(
            kernel,
            out_shape=jax.ShapeDtypeStruct((B, 1, NLP), jnp.float32),
            grid=grid,
            in_specs=[
                pl.BlockSpec((tb, SP, HP), lambda i: (i, 0, 0)),   # h[-1]
                pl.BlockSpec((tb, SP, HP), lambda i: (i, 0, 0)),   # h[-2]
                pl.BlockSpec((tb, SP, HP), lambda i: (i, 0, 0)),   # h[-3]
                wspec((7 * HP, CF)),     # fused im2col conv weight (resident)
                wspec((1, CF)),          # fused conv bias
                wspec((HP, NLP)),        # out-Linear (cls rows)
                wspec((CF, NLP)),        # out-Linear (conv rows)
                wspec((1, NLP)),         # out-Linear bias
            ],
            out_specs=pl.BlockSpec((tb, 1, NLP), lambda i: (i, 0, 0)),
            compiler_params=pltpu.CompilerParams(
                dimension_semantics=("parallel",),                 # megacore split
                vmem_limit_bytes=vmem_limit),
        )

    args = (h1b, h2b, h3b, wf, bf, wo_cls, wo_conv, bo)
    try:
        out = build(True)(*args)
        jax.block_until_ready(out)
    except Exception:
        # Fallback if this JAX build rejects pipeline_mode=pl.Buffered(1) on
        # pallas_call BlockSpecs: identical semantics, default double buffers.
        out = build(False)(*args)

    return out[:, 0, :NL]                                          # strip label padding


def _reference(h1, h2, h3, params):
    """Pure-JAX f32 reference of the PyTorch forward (post-backbone)."""
    seq = (h1 + h2 + h3) / 3.0
    cls = seq[:, 0, :]
    tok = seq[:, 1:, :]                                   # (B, S-1, H)
    feats = [cls]
    for k in (3, 5, 7):
        w = params[f"w{k}"]                               # (k, H, cout)
        b = params[f"b{k}"][0]
        pad = (k - 1) // 2
        tp = jnp.pad(tok, ((0, 0), (pad, pad), (0, 0)))
        outs = []
        for t in range(tok.shape[1]):
            win = tp[:, t:t + k, :]                       # (B, k, H)
            outs.append(jnp.einsum("bkh,khc->bc", win, w) + b)
        conv = jnp.stack(outs, axis=1)                    # (B, S-1, cout)
        feats.append(jnp.max(jax.nn.relu(conv), axis=1))
    feat = jnp.concatenate(feats, axis=1)                 # (B, H + 3*cout)
    logits = feat @ params["wo"] + params["bo"]
    return jnp.clip(jax.nn.sigmoid(logits), 1e-7, 1.0 - 1e-7)


if __name__ == "__main__":
    # Small shapes consistent with the module: batch=2, seq=9 (8 tokens after
    # dropping CLS), hidden=32 (= conv in_channels), conv out_channels=32,
    # num_labels=4.  Linear in_features = 32 + 3*32 = 128.
    B, S, H, COUT, NUM_LABELS = 2, 9, 32, 32, 4

    key = jax.random.PRNGKey(0)
    keys = jax.random.split(key, 11)

    # Last three backbone hidden states (synthetic, deterministic).
    h1 = jax.random.normal(keys[0], (B, S, H), jnp.float32)
    h2 = jax.random.normal(keys[1], (B, S, H), jnp.float32)
    h3 = jax.random.normal(keys[2], (B, S, H), jnp.float32)

    def conv_params(kw, kb, ksize):
        # stored as (K, H, Cout): PyTorch Conv1d weight (Cout, H, K) transposed.
        w = jax.random.normal(kw, (ksize, H, COUT), jnp.float32) * 0.05
        b = jax.random.normal(kb, (1, COUT), jnp.float32) * 0.05
        return w, b

    w3, b3 = conv_params(keys[3], keys[4], 3)
    w5, b5 = conv_params(keys[5], keys[6], 5)
    w7, b7 = conv_params(keys[7], keys[8], 7)
    wo = jax.random.normal(keys[9], (H + 3 * COUT, NUM_LABELS), jnp.float32) * 0.05
    bo = jax.random.normal(keys[10], (1, NUM_LABELS), jnp.float32) * 0.05

    params = dict(w3=w3, b3=b3, w5=w5, b5=b5, w7=w7, b7=b7, wo=wo, bo=bo)

    out = bertcnn_forward(h1, h2, h3, params)
    jax.block_until_ready(out)

    ref = _reference(h1, h2, h3, params)
    assert out.shape == (B, NUM_LABELS)
    assert bool(jnp.all(jnp.isfinite(out)))
    max_err = float(jnp.max(jnp.abs(out - ref)))
    assert max_err < 2e-2, f"max abs error vs f32 reference: {max_err}"
    print("KERNEL_OK")
</pallas_src>

<mosaic_0001>
module attributes {stable_mosaic.version = 11 : i64} {
  func.func @_bertcnn_kernel(%arg0: i32, %arg1: memref<1x16x128xbf16, #tpu.memory_space<vmem>>, %arg2: memref<1x16x128xbf16, #tpu.memory_space<vmem>>, %arg3: memref<1x16x128xbf16, #tpu.memory_space<vmem>>, %arg4: memref<896x128xbf16, #tpu.memory_space<vmem>>, %arg5: memref<1x128xf32, #tpu.memory_space<vmem>>, %arg6: memref<128x128xbf16, #tpu.memory_space<vmem>>, %arg7: memref<128x128xbf16, #tpu.memory_space<vmem>>, %arg8: memref<1x128xf32, #tpu.memory_space<vmem>>, %arg9: memref<1x1x128xf32, #tpu.memory_space<vmem>>) attributes {dimension_semantics = [#tpu.dimension_semantics<parallel>], iteration_bounds = array<i64: 2>, scalar_prefetch = 0 : i64, scratch_operands = 0 : i64, tpu.core_type = #tpu.core_type<tc>, window_params = [{transform_indices = @transform_0, window_bounds = array<i64: 1, 16, 128>}, {transform_indices = @transform_1, window_bounds = array<i64: 1, 16, 128>}, {transform_indices = @transform_2, window_bounds = array<i64: 1, 16, 128>}, {pipeline_mode = #tpu.pipeline_mode<synchronous>, transform_indices = @transform_3, window_bounds = array<i64: 896, 128>}, {pipeline_mode = #tpu.pipeline_mode<synchronous>, transform_indices = @transform_4, window_bounds = array<i64: 1, 128>}, {pipeline_mode = #tpu.pipeline_mode<synchronous>, transform_indices = @transform_5, window_bounds = array<i64: 128, 128>}, {pipeline_mode = #tpu.pipeline_mode<synchronous>, transform_indices = @transform_6, window_bounds = array<i64: 128, 128>}, {pipeline_mode = #tpu.pipeline_mode<synchronous>, transform_indices = @transform_7, window_bounds = array<i64: 1, 128>}, {transform_indices = @transform_8, window_bounds = array<i64: 1, 1, 128>}]} {
    %c0 = arith.constant 0 : index
    %c0_0 = arith.constant 0 : index
    %c0_1 = arith.constant 0 : index
    %0 = vector.load %arg1[%c0, %c0_0, %c0_1] : memref<1x16x128xbf16, #tpu.memory_space<vmem>>, vector<1x16x128xbf16>
    %1 = arith.extf %0 : vector<1x16x128xbf16> to vector<1x16x128xf32>
    %c0_2 = arith.constant 0 : index
    %c0_3 = arith.constant 0 : index
    %c0_4 = arith.constant 0 : index
    %2 = vector.load %arg2[%c0_2, %c0_3, %c0_4] : memref<1x16x128xbf16, #tpu.memory_space<vmem>>, vector<1x16x128xbf16>
    %3 = arith.extf %2 : vector<1x16x128xbf16> to vector<1x16x128xf32>
    %4 = arith.addf %1, %3 : vector<1x16x128xf32>
    %c0_5 = arith.constant 0 : index
    %c0_6 = arith.constant 0 : index
    %c0_7 = arith.constant 0 : index
    %5 = vector.load %arg3[%c0_5, %c0_6, %c0_7] : memref<1x16x128xbf16, #tpu.memory_space<vmem>>, vector<1x16x128xbf16>
    %6 = arith.extf %5 : vector<1x16x128xbf16> to vector<1x16x128xf32>
    %7 = arith.addf %4, %6 : vector<1x16x128xf32>
    %cst = arith.constant 0.333333343 : f32
    %8 = vector.broadcast %cst : f32 to vector<1x16x128xf32>
    %9 = arith.mulf %7, %8 : vector<1x16x128xf32>
    %10 = vector.extract_strided_slice %9 {offsets = [0, 0, 0], sizes = [1, 1, 128], strides = [1, 1, 1]} : vector<1x16x128xf32> to vector<1x1x128xf32>
    %11 = vector.shape_cast %10 : vector<1x1x128xf32> to vector<1x128xf32>
    %12 = tpu.iota {dimensions = array<i32: 1>} : vector<1x16x1xi32>
    %c0_i32 = arith.constant 0 : i32
    %13 = vector.broadcast %c0_i32 : i32 to vector<1x16x1xi32>
    %14 = arith.cmpi sgt, %12, %13 : vector<1x16x1xi32>
    %c9_i32 = arith.constant 9 : i32
    %15 = vector.broadcast %c9_i32 : i32 to vector<1x16x1xi32>
    %16 = arith.cmpi slt, %12, %15 : vector<1x16x1xi32>
    %17 = arith.andi %14, %16 : vector<1x16x1xi1>
    %cst_8 = arith.constant 0.000000e+00 : f32
    %18 = vector.shape_cast %17 : vector<1x16x1xi1> to vector<1x16x1xi1>
    %19 = vector.broadcast %18 : vector<1x16x1xi1> to vector<1x16x128xi1>
    %20 = vector.broadcast %cst_8 : f32 to vector<1x16x128xf32>
    %21 = arith.select %19, %9, %20 : vector<1x16x128xi1>, vector<1x16x128xf32>
    %22 = arith.truncf %21 : vector<1x16x128xf32> to vector<1x16x128xbf16>
    %cst_9 = arith.constant 0.000000e+00 : bf16
    %23 = vector.broadcast %cst_9 : bf16 to vector<1x3x128xbf16>
    %24 = tpu.concatenate %23, %22, %23 in 1 : vector<1x3x128xbf16>, vector<1x16x128xbf16>, vector<1x3x128xbf16> -> vector<1x22x128xbf16>
    %25 = vector.extract_strided_slice %24 {offsets = [0, 0, 0], sizes = [1, 16, 128], strides = [1, 1, 1]} : vector<1x22x128xbf16> to vector<1x16x128xbf16>
    %26 = vector.extract_strided_slice %24 {offsets = [0, 1, 0], sizes = [1, 16, 128], strides = [1, 1, 1]} : vector<1x22x128xbf16> to vector<1x16x128xbf16>
    %27 = vector.extract_strided_slice %24 {offsets = [0, 2, 0], sizes = [1, 16, 128], strides = [1, 1, 1]} : vector<1x22x128xbf16> to vector<1x16x128xbf16>
    %28 = vector.extract_strided_slice %24 {offsets = [0, 3, 0], sizes = [1, 16, 128], strides = [1, 1, 1]} : vector<1x22x128xbf16> to vector<1x16x128xbf16>
    %29 = vector.extract_strided_slice %24 {offsets = [0, 4, 0], sizes = [1, 16, 128], strides = [1, 1, 1]} : vector<1x22x128xbf16> to vector<1x16x128xbf16>
    %30 = vector.extract_strided_slice %24 {offsets = [0, 5, 0], sizes = [1, 16, 128], strides = [1, 1, 1]} : vector<1x22x128xbf16> to vector<1x16x128xbf16>
    %31 = vector.extract_strided_slice %24 {offsets = [0, 6, 0], sizes = [1, 16, 128], strides = [1, 1, 1]} : vector<1x22x128xbf16> to vector<1x16x128xbf16>
    %32 = tpu.concatenate %25, %26, %27, %28, %29, %30, %31 in 2 : vector<1x16x128xbf16>, vector<1x16x128xbf16>, vector<1x16x128xbf16>, vector<1x16x128xbf16>, vector<1x16x128xbf16>, vector<1x16x128xbf16>, vector<1x16x128xbf16> -> vector<1x16x896xbf16>
    %33 = vector.shape_cast %32 : vector<1x16x896xbf16> to vector<16x896xbf16>
    %c0_10 = arith.constant 0 : index
    %c0_11 = arith.constant 0 : index
    %34 = vector.load %arg4[%c0_10, %c0_11] : memref<896x128xbf16, #tpu.memory_space<vmem>>, vector<896x128xbf16>
    %cst_12 = arith.constant dense<0.000000e+00> : vector<16x128xf32>
    %35 = tpu.matmul %33, %34, %cst_12 {dimension_numbers = #tpu.dot_dimension_numbers<[1], [0], [0], [1], [0, 0, 1, 1], [], []>} : vector<16x896xbf16>, vector<896x128xbf16>, vector<16x128xf32> -> vector<16x128xf32>
    %c0_13 = arith.constant 0 : index
    %c0_14 = arith.constant 0 : index
    %36 = vector.load %arg5[%c0_13, %c0_14] : memref<1x128xf32, #tpu.memory_space<vmem>>, vector<1x128xf32>
    %37 = vector.broadcast %36 : vector<1x128xf32> to vector<16x128xf32>
    %38 = arith.addf %35, %37 : vector<16x128xf32>
    %39 = vector.shape_cast %38 : vector<16x128xf32> to vector<1x16x128xf32>
    %cst_15 = arith.constant 0.000000e+00 : f32
    %40 = vector.broadcast %cst_15 : f32 to vector<1x16x128xf32>
    %41 = arith.maximumf %39, %40 : vector<1x16x128xf32>
    %cst_16 = arith.constant 0.000000e+00 : f32
    %42 = vector.shape_cast %17 : vector<1x16x1xi1> to vector<1x16x1xi1>
    %43 = vector.broadcast %42 : vector<1x16x1xi1> to vector<1x16x128xi1>
    %44 = vector.broadcast %cst_16 : f32 to vector<1x16x128xf32>
    %45 = arith.select %43, %41, %44 : vector<1x16x128xi1>, vector<1x16x128xf32>
    %cst_17 = arith.constant dense<0xFF800000> : vector<1x128xf32>
    %46 = vector.multi_reduction <maximumf>, %45, %cst_17 [1] : vector<1x16x128xf32> to vector<1x128xf32>
    %47 = arith.truncf %11 : vector<1x128xf32> to vector<1x128xbf16>
    %c0_18 = arith.constant 0 : index
    %c0_19 = arith.constant 0 : index
    %48 = vector.load %arg6[%c0_18, %c0_19] : memref<128x128xbf16, #tpu.memory_space<vmem>>, vector<128x128xbf16>
    %cst_20 = arith.constant dense<0.000000e+00> : vector<1x128xf32>
    %49 = tpu.matmul %47, %48, %cst_20 {dimension_numbers = #tpu.dot_dimension_numbers<[1], [0], [0], [1], [0, 0, 1, 1], [], []>} : vector<1x128xbf16>, vector<128x128xbf16>, vector<1x128xf32> -> vector<1x128xf32>
    %50 = arith.truncf %46 : vector<1x128xf32> to vector<1x128xbf16>
    %c0_21 = arith.constant 0 : index
    %c0_22 = arith.constant 0 : index
    %51 = vector.load %arg7[%c0_21, %c0_22] : memref<128x128xbf16, #tpu.memory_space<vmem>>, vector<128x128xbf16>
    %cst_23 = arith.constant dense<0.000000e+00> : vector<1x128xf32>
    %52 = tpu.matmul %50, %51, %cst_23 {dimension_numbers = #tpu.dot_dimension_numbers<[1], [0], [0], [1], [0, 0, 1, 1], [], []>} : vector<1x128xbf16>, vector<128x128xbf16>, vector<1x128xf32> -> vector<1x128xf32>
    %53 = arith.addf %49, %52 : vector<1x128xf32>
    %c0_24 = arith.constant 0 : index
    %c0_25 = arith.constant 0 : index
    %54 = vector.load %arg8[%c0_24, %c0_25] : memref<1x128xf32, #tpu.memory_space<vmem>>, vector<1x128xf32>
    %55 = arith.addf %53, %54 : vector<1x128xf32>
    %cst_26 = arith.constant 0.000000e+00 : f32
    %56 = vector.broadcast %cst_26 : f32 to vector<1x128xf32>
    %57 = arith.subf %56, %55 : vector<1x128xf32>
    %58 = math.exp %57 : vector<1x128xf32>
    %cst_27 = arith.constant 1.000000e+00 : f32
    %59 = vector.broadcast %cst_27 : f32 to vector<1x128xf32>
    %60 = arith.addf %59, %58 : vector<1x128xf32>
    %cst_28 = arith.constant 1.000000e+00 : f32
    %61 = vector.broadcast %cst_28 : f32 to vector<1x128xf32>
    %62 = arith.divf %61, %60 : vector<1x128xf32>
    %cst_29 = arith.constant 1.000000e-07 : f32
    %cst_30 = arith.constant 0.99999988 : f32
    %63 = vector.broadcast %cst_29 : f32 to vector<1x128xf32>
    %64 = arith.maximumf %63, %62 : vector<1x128xf32>
    %65 = vector.broadcast %cst_30 : f32 to vector<1x128xf32>
    %66 = arith.minimumf %65, %64 : vector<1x128xf32>
    %67 = vector.shape_cast %66 : vector<1x128xf32> to vector<1x1x128xf32>
    %c0_31 = arith.constant 0 : index
    %c0_32 = arith.constant 0 : index
    %c0_33 = arith.constant 0 : index
    %68 = vector.load %arg9[%c0_31, %c0_32, %c0_33] : memref<1x1x128xf32, #tpu.memory_space<vmem>>, vector<1x1x128xf32>
    tpu.vector_store %arg9[%c0_31, %c0_32, %c0_33], %67 {strides = array<i32>} : memref<1x1x128xf32, #tpu.memory_space<vmem>>, vector<1x1x128xf32>,
    return
  }
  func.func @transform_0(%arg0: i32) -> (i32, i32, i32) {
    %c0_i32 = arith.constant 0 : i32
    %c0_i32_0 = arith.constant 0 : i32
    %c0_i32_1 = arith.constant 0 : i32
    return %arg0, %c0_i32, %c0_i32_0 : i32, i32, i32
  }
  func.func @transform_1(%arg0: i32) -> (i32, i32, i32) {
    %c0_i32 = arith.constant 0 : i32
    %c0_i32_0 = arith.constant 0 : i32
    %c0_i32_1 = arith.constant 0 : i32
    return %arg0, %c0_i32, %c0_i32_0 : i32, i32, i32
  }
  func.func @transform_2(%arg0: i32) -> (i32, i32, i32) {
    %c0_i32 = arith.constant 0 : i32
    %c0_i32_0 = arith.constant 0 : i32
    %c0_i32_1 = arith.constant 0 : i32
    return %arg0, %c0_i32, %c0_i32_0 : i32, i32, i32
  }
  func.func @transform_3(%arg0: i32) -> (i32, i32) {
    %c0_i32 = arith.constant 0 : i32
    %c0_i32_0 = arith.constant 0 : i32
    %c0_i32_1 = arith.constant 0 : i32
    return %c0_i32, %c0_i32_0 : i32, i32
  }
  func.func @transform_4(%arg0: i32) -> (i32, i32) {
    %c0_i32 = arith.constant 0 : i32
    %c0_i32_0 = arith.constant 0 : i32
    %c0_i32_1 = arith.constant 0 : i32
    return %c0_i32, %c0_i32_0 : i32, i32
  }
  func.func @transform_5(%arg0: i32) -> (i32, i32) {
    %c0_i32 = arith.constant 0 : i32
    %c0_i32_0 = arith.constant 0 : i32
    %c0_i32_1 = arith.constant 0 : i32
    return %c0_i32, %c0_i32_0 : i32, i32
  }
  func.func @transform_6(%arg0: i32) -> (i32, i32) {
    %c0_i32 = arith.constant 0 : i32
    %c0_i32_0 = arith.constant 0 : i32
    %c0_i32_1 = arith.constant 0 : i32
    return %c0_i32, %c0_i32_0 : i32, i32
  }
  func.func @transform_7(%arg0: i32) -> (i32, i32) {
    %c0_i32 = arith.constant 0 : i32
    %c0_i32_0 = arith.constant 0 : i32
    %c0_i32_1 = arith.constant 0 : i32
    return %c0_i32, %c0_i32_0 : i32, i32
  }
  func.func @transform_8(%arg0: i32) -> (i32, i32, i32) {
    %c0_i32 = arith.constant 0 : i32
    %c0_i32_0 = arith.constant 0 : i32
    %c0_i32_1 = arith.constant 0 : i32
    return %arg0, %c0_i32, %c0_i32_0 : i32, i32, i32
  }
}

module attributes {stable_mosaic.version = 11 : i64} {
  func.func @_bertcnn_kernel(%arg0: i32, %arg1: memref<1x16x128xbf16, #tpu.memory_space<vmem>>, %arg2: memref<1x16x128xbf16, #tpu.memory_space<vmem>>, %arg3: memref<1x16x128xbf16, #tpu.memory_space<vmem>>, %arg4: memref<896x128xbf16, #tpu.memory_space<vmem>>, %arg5: memref<1x128xf32, #tpu.memory_space<vmem>>, %arg6: memref<128x128xbf16, #tpu.memory_space<vmem>>, %arg7: memref<128x128xbf16, #tpu.memory_space<vmem>>, %arg8: memref<1x128xf32, #tpu.memory_space<vmem>>, %arg9: memref<1x1x128xf32, #tpu.memory_space<vmem>>) attributes {dimension_semantics = [#tpu.dimension_semantics<parallel>], iteration_bounds = array<i64: 2>, scalar_prefetch = 0 : i64, scratch_operands = 0 : i64, tpu.core_type = #tpu.core_type<tc>, window_params = [{transform_indices = @transform_0, window_bounds = array<i64: 1, 16, 128>}, {transform_indices = @transform_1, window_bounds = array<i64: 1, 16, 128>}, {transform_indices = @transform_2, window_bounds = array<i64: 1, 16, 128>}, {pipeline_mode = #tpu.pipeline_mode<synchronous>, transform_indices = @transform_3, window_bounds = array<i64: 896, 128>}, {pipeline_mode = #tpu.pipeline_mode<synchronous>, transform_indices = @transform_4, window_bounds = array<i64: 1, 128>}, {pipeline_mode = #tpu.pipeline_mode<synchronous>, transform_indices = @transform_5, window_bounds = array<i64: 128, 128>}, {pipeline_mode = #tpu.pipeline_mode<synchronous>, transform_indices = @transform_6, window_bounds = array<i64: 128, 128>}, {pipeline_mode = #tpu.pipeline_mode<synchronous>, transform_indices = @transform_7, window_bounds = array<i64: 1, 128>}, {transform_indices = @transform_8, window_bounds = array<i64: 1, 1, 128>}]} {
    %c0 = arith.constant 0 : index
    %c0_0 = arith.constant 0 : index
    %c0_1 = arith.constant 0 : index
    %0 = vector.load %arg1[%c0, %c0_0, %c0_1] : memref<1x16x128xbf16, #tpu.memory_space<vmem>>, vector<1x16x128xbf16>
    %1 = arith.extf %0 : vector<1x16x128xbf16> to vector<1x16x128xf32>
    %c0_2 = arith.constant 0 : index
    %c0_3 = arith.constant 0 : index
    %c0_4 = arith.constant 0 : index
    %2 = vector.load %arg2[%c0_2, %c0_3, %c0_4] : memref<1x16x128xbf16, #tpu.memory_space<vmem>>, vector<1x16x128xbf16>
    %3 = arith.extf %2 : vector<1x16x128xbf16> to vector<1x16x128xf32>
    %4 = arith.addf %1, %3 : vector<1x16x128xf32>
    %c0_5 = arith.constant 0 : index
    %c0_6 = arith.constant 0 : index
    %c0_7 = arith.constant 0 : index
    %5 = vector.load %arg3[%c0_5, %c0_6, %c0_7] : memref<1x16x128xbf16, #tpu.memory_space<vmem>>, vector<1x16x128xbf16>
    %6 = arith.extf %5 : vector<1x16x128xbf16> to vector<1x16x128xf32>
    %7 = arith.addf %4, %6 : vector<1x16x128xf32>
    %cst = arith.constant 0.333333343 : f32
    %8 = vector.broadcast %cst : f32 to vector<1x16x128xf32>
    %9 = arith.mulf %7, %8 : vector<1x16x128xf32>
    %10 = vector.extract_strided_slice %9 {offsets = [0, 0, 0], sizes = [1, 1, 128], strides = [1, 1, 1]} : vector<1x16x128xf32> to vector<1x1x128xf32>
    %11 = vector.shape_cast %10 : vector<1x1x128xf32> to vector<1x128xf32>
    %12 = tpu.iota {dimensions = array<i32: 1>} : vector<1x16x1xi32>
    %c0_i32 = arith.constant 0 : i32
    %13 = vector.broadcast %c0_i32 : i32 to vector<1x16x1xi32>
    %14 = arith.cmpi sgt, %12, %13 : vector<1x16x1xi32>
    %c9_i32 = arith.constant 9 : i32
    %15 = vector.broadcast %c9_i32 : i32 to vector<1x16x1xi32>
    %16 = arith.cmpi slt, %12, %15 : vector<1x16x1xi32>
    %17 = arith.andi %14, %16 : vector<1x16x1xi1>
    %cst_8 = arith.constant 0.000000e+00 : f32
    %18 = vector.shape_cast %17 : vector<1x16x1xi1> to vector<1x16x1xi1>
    %19 = vector.broadcast %18 : vector<1x16x1xi1> to vector<1x16x128xi1>
    %20 = vector.broadcast %cst_8 : f32 to vector<1x16x128xf32>
    %21 = arith.select %19, %9, %20 : vector<1x16x128xi1>, vector<1x16x128xf32>
    %22 = arith.truncf %21 : vector<1x16x128xf32> to vector<1x16x128xbf16>
    %cst_9 = arith.constant 0.000000e+00 : bf16
    %23 = vector.broadcast %cst_9 : bf16 to vector<1x3x128xbf16>
    %24 = tpu.concatenate %23, %22, %23 in 1 : vector<1x3x128xbf16>, vector<1x16x128xbf16>, vector<1x3x128xbf16> -> vector<1x22x128xbf16>
    %25 = vector.extract_strided_slice %24 {offsets = [0, 0, 0], sizes = [1, 16, 128], strides = [1, 1, 1]} : vector<1x22x128xbf16> to vector<1x16x128xbf16>
    %26 = vector.extract_strided_slice %24 {offsets = [0, 1, 0], sizes = [1, 16, 128], strides = [1, 1, 1]} : vector<1x22x128xbf16> to vector<1x16x128xbf16>
    %27 = vector.extract_strided_slice %24 {offsets = [0, 2, 0], sizes = [1, 16, 128], strides = [1, 1, 1]} : vector<1x22x128xbf16> to vector<1x16x128xbf16>
    %28 = vector.extract_strided_slice %24 {offsets = [0, 3, 0], sizes = [1, 16, 128], strides = [1, 1, 1]} : vector<1x22x128xbf16> to vector<1x16x128xbf16>
    %29 = vector.extract_strided_slice %24 {offsets = [0, 4, 0], sizes = [1, 16, 128], strides = [1, 1, 1]} : vector<1x22x128xbf16> to vector<1x16x128xbf16>
    %30 = vector.extract_strided_slice %24 {offsets = [0, 5, 0], sizes = [1, 16, 128], strides = [1, 1, 1]} : vector<1x22x128xbf16> to vector<1x16x128xbf16>
    %31 = vector.extract_strided_slice %24 {offsets = [0, 6, 0], sizes = [1, 16, 128], strides = [1, 1, 1]} : vector<1x22x128xbf16> to vector<1x16x128xbf16>
    %32 = tpu.concatenate %25, %26, %27, %28, %29, %30, %31 in 2 : vector<1x16x128xbf16>, vector<1x16x128xbf16>, vector<1x16x128xbf16>, vector<1x16x128xbf16>, vector<1x16x128xbf16>, vector<1x16x128xbf16>, vector<1x16x128xbf16> -> vector<1x16x896xbf16>
    %33 = vector.shape_cast %32 : vector<1x16x896xbf16> to vector<16x896xbf16>
    %c0_10 = arith.constant 0 : index
    %c0_11 = arith.constant 0 : index
    %34 = vector.load %arg4[%c0_10, %c0_11] : memref<896x128xbf16, #tpu.memory_space<vmem>>, vector<896x128xbf16>
    %cst_12 = arith.constant dense<0.000000e+00> : vector<16x128xf32>
    %35 = tpu.matmul %33, %34, %cst_12 {dimension_numbers = #tpu.dot_dimension_numbers<[1], [0], [0], [1], [0, 0, 1, 1], [], []>} : vector<16x896xbf16>, vector<896x128xbf16>, vector<16x128xf32> -> vector<16x128xf32>
    %c0_13 = arith.constant 0 : index
    %c0_14 = arith.constant 0 : index
    %36 = vector.load %arg5[%c0_13, %c0_14] : memref<1x128xf32, #tpu.memory_space<vmem>>, vector<1x128xf32>
    %37 = vector.broadcast %36 : vector<1x128xf32> to vector<16x128xf32>
    %38 = arith.addf %35, %37 : vector<16x128xf32>
    %39 = vector.shape_cast %38 : vector<16x128xf32> to vector<1x16x128xf32>
    %cst_15 = arith.constant 0.000000e+00 : f32
    %40 = vector.broadcast %cst_15 : f32 to vector<1x16x128xf32>
    %41 = arith.maximumf %39, %40 : vector<1x16x128xf32>
    %cst_16 = arith.constant 0.000000e+00 : f32
    %42 = vector.shape_cast %17 : vector<1x16x1xi1> to vector<1x16x1xi1>
    %43 = vector.broadcast %42 : vector<1x16x1xi1> to vector<1x16x128xi1>
    %44 = vector.broadcast %cst_16 : f32 to vector<1x16x128xf32>
    %45 = arith.select %43, %41, %44 : vector<1x16x128xi1>, vector<1x16x128xf32>
    %cst_17 = arith.constant dense<0xFF800000> : vector<1x128xf32>
    %46 = vector.multi_reduction <maximumf>, %45, %cst_17 [1] : vector<1x16x128xf32> to vector<1x128xf32>
    %47 = arith.truncf %11 : vector<1x128xf32> to vector<1x128xbf16>
    %c0_18 = arith.constant 0 : index
    %c0_19 = arith.constant 0 : index
    %48 = vector.load %arg6[%c0_18, %c0_19] : memref<128x128xbf16, #tpu.memory_space<vmem>>, vector<128x128xbf16>
    %cst_20 = arith.constant dense<0.000000e+00> : vector<1x128xf32>
    %49 = tpu.matmul %47, %48, %cst_20 {dimension_numbers = #tpu.dot_dimension_numbers<[1], [0], [0], [1], [0, 0, 1, 1], [], []>} : vector<1x128xbf16>, vector<128x128xbf16>, vector<1x128xf32> -> vector<1x128xf32>
    %50 = arith.truncf %46 : vector<1x128xf32> to vector<1x128xbf16>
    %c0_21 = arith.constant 0 : index
    %c0_22 = arith.constant 0 : index
    %51 = vector.load %arg7[%c0_21, %c0_22] : memref<128x128xbf16, #tpu.memory_space<vmem>>, vector<128x128xbf16>
    %cst_23 = arith.constant dense<0.000000e+00> : vector<1x128xf32>
    %52 = tpu.matmul %50, %51, %cst_23 {dimension_numbers = #tpu.dot_dimension_numbers<[1], [0], [0], [1], [0, 0, 1, 1], [], []>} : vector<1x128xbf16>, vector<128x128xbf16>, vector<1x128xf32> -> vector<1x128xf32>
    %53 = arith.addf %49, %52 : vector<1x128xf32>
    %c0_24 = arith.constant 0 : index
    %c0_25 = arith.constant 0 : index
    %54 = vector.load %arg8[%c0_24, %c0_25] : memref<1x128xf32, #tpu.memory_space<vmem>>, vector<1x128xf32>
    %55 = arith.addf %53, %54 : vector<1x128xf32>
    %cst_26 = arith.constant 0.000000e+00 : f32
    %56 = vector.broadcast %cst_26 : f32 to vector<1x128xf32>
    %57 = arith.subf %56, %55 : vector<1x128xf32>
    %58 = math.exp %57 : vector<1x128xf32>
    %cst_27 = arith.constant 1.000000e+00 : f32
    %59 = vector.broadcast %cst_27 : f32 to vector<1x128xf32>
    %60 = arith.addf %59, %58 : vector<1x128xf32>
    %cst_28 = arith.constant 1.000000e+00 : f32
    %61 = vector.broadcast %cst_28 : f32 to vector<1x128xf32>
    %62 = arith.divf %61, %60 : vector<1x128xf32>
    %cst_29 = arith.constant 1.000000e-07 : f32
    %cst_30 = arith.constant 0.99999988 : f32
    %63 = vector.broadcast %cst_29 : f32 to vector<1x128xf32>
    %64 = arith.maximumf %63, %62 : vector<1x128xf32>
    %65 = vector.broadcast %cst_30 : f32 to vector<1x128xf32>
    %66 = arith.minimumf %65, %64 : vector<1x128xf32>
    %67 = vector.shape_cast %66 : vector<1x128xf32> to vector<1x1x128xf32>
    %c0_31 = arith.constant 0 : index
    %c0_32 = arith.constant 0 : index
    %c0_33 = arith.constant 0 : index
    %68 = vector.load %arg9[%c0_31, %c0_32, %c0_33] : memref<1x1x128xf32, #tpu.memory_space<vmem>>, vector<1x1x128xf32>
    tpu.vector_store %arg9[%c0_31, %c0_32, %c0_33], %67 {strides = array<i32>} : memref<1x1x128xf32, #tpu.memory_space<vmem>>, vector<1x1x128xf32>,
    return
  }
  func.func @transform_0(%arg0: i32) -> (i32, i32, i32) {
    %c0_i32 = arith.constant 0 : i32
    %c0_i32_0 = arith.constant 0 : i32
    %c0_i32_1 = arith.constant 0 : i32
    return %arg0, %c0_i32, %c0_i32_0 : i32, i32, i32
  }
  func.func @transform_1(%arg0: i32) -> (i32, i32, i32) {
    %c0_i32 = arith.constant 0 : i32
    %c0_i32_0 = arith.constant 0 : i32
    %c0_i32_1 = arith.constant 0 : i32
    return %arg0, %c0_i32, %c0_i32_0 : i32, i32, i32
  }
  func.func @transform_2(%arg0: i32) -> (i32, i32, i32) {
    %c0_i32 = arith.constant 0 : i32
    %c0_i32_0 = arith.constant 0 : i32
    %c0_i32_1 = arith.constant 0 : i32
    return %arg0, %c0_i32, %c0_i32_0 : i32, i32, i32
  }
  func.func @transform_3(%arg0: i32) -> (i32, i32) {
    %c0_i32 = arith.constant 0 : i32
    %c0_i32_0 = arith.constant 0 : i32
    %c0_i32_1 = arith.constant 0 : i32
    return %c0_i32, %c0_i32_0 : i32, i32
  }
  func.func @transform_4(%arg0: i32) -> (i32, i32) {
    %c0_i32 = arith.constant 0 : i32
    %c0_i32_0 = arith.constant 0 : i32
    %c0_i32_1 = arith.constant 0 : i32
    return %c0_i32, %c0_i32_0 : i32, i32
  }
  func.func @transform_5(%arg0: i32) -> (i32, i32) {
    %c0_i32 = arith.constant 0 : i32
    %c0_i32_0 = arith.constant 0 : i32
    %c0_i32_1 = arith.constant 0 : i32
    return %c0_i32, %c0_i32_0 : i32, i32
  }
  func.func @transform_6(%arg0: i32) -> (i32, i32) {
    %c0_i32 = arith.constant 0 : i32
    %c0_i32_0 = arith.constant 0 : i32
    %c0_i32_1 = arith.constant 0 : i32
    return %c0_i32, %c0_i32_0 : i32, i32
  }
  func.func @transform_7(%arg0: i32) -> (i32, i32) {
    %c0_i32 = arith.constant 0 : i32
    %c0_i32_0 = arith.constant 0 : i32
    %c0_i32_1 = arith.constant 0 : i32
    return %c0_i32, %c0_i32_0 : i32, i32
  }
  func.func @transform_8(%arg0: i32) -> (i32, i32, i32) {
    %c0_i32 = arith.constant 0 : i32
    %c0_i32_0 = arith.constant 0 : i32
    %c0_i32_1 = arith.constant 0 : i32
    return %arg0, %c0_i32, %c0_i32_0 : i32, i32, i32
  }
}

</mosaic_0001>

<bundles_post_ra>
// kernel: tpu_custom_call.1
= control target key start
LH: loop header
LB: loop body
LE: loop exit
PB: predicated region body
PF: predicated region fallthrough
CT: control target
= control target key end

     0   :  { %s2648_s0 = inlined_call_operand.hbm [shape: bf16[2,16,128], index: 0, kind: input, shape index: {}]   ;;  %s2649_s1 = inlined_call_operand.hbm [shape: bf16[2,16,128], index: 1, kind: input, shape index: {}]   ;;  %s2650_s2 = inlined_call_operand.hbm [shape: bf16[2,16,128], index: 2, kind: input, shape index: {}]   ;;  %s2651_s3 = inlined_call_operand.hbm [shape: bf16[896,128], index: 3, kind: input, shape index: {}]   ;;  %s2652_s4 = inlined_call_operand.vmem [shape: f32[1,128], index: 4, kind: input, shape index: {}]   ;;  %s2653_s5 = inlined_call_operand.hbm [shape: bf16[128,128], index: 5, kind: input, shape index: {}]   ;;  %s2654_s6 = inlined_call_operand.hbm [shape: bf16[128,128], index: 6, kind: input, shape index: {}]   ;;  %s2655_s7 = inlined_call_operand.vmem [shape: f32[1,128], index: 7, kind: input, shape index: {}]   ;;  %s2656_s8 = inlined_call_operand.hbm [shape: f32[2,1,128], index: 8, kind: output, shape index: {}]  }
   0x1   :  { %2674 = sst [smem:[#allocation24_spill]] %s2649_s1 }
   0x2   :  { %2675 = sst [smem:[#allocation25_spill]] %s2651_s3 }
   0x3   :  { %2676 = sst [smem:[#allocation26_spill]] %s2653_s5 }
   0x4   :  { %2677 = sst [smem:[#allocation27_spill]] %s2654_s6 }
   0x5   :  { %13 = vsyncpa [#allocation3], 0 }
   0x6   :  { %15 = vsyncpa [#allocation3 + $0x1], 0 }
   0x7   :  { %16 = vsyncpa [#allocation6], 0 }
   0x8   :  { %18 = vsyncpa [#allocation6 + $0x1], 0 }
   0x9   :  { %19 = vsyncpa [#allocation9], 0 }
   0xa   :  { %20 = vsyncpa [#allocation12], 0 }
   0xb   :  { %21 = vsyncpa [#allocation4], 0 }
   0xc   :  { %23 = vsyncpa [#allocation4 + $0x1], 0  ;;  %s2275_s27 = smov 0   ;;  %s2277_s28 = smov 0  }
   0xd   :  { %s2279_s29 = smov 0   ;;  %s2281_s30 = smov 0  }
   0xe LB: > { %2678 = sst [smem:[#allocation19_spill]] %s2205_s27  ;;  %s2296_s9 = sadd.s32 4294967295, %s2217_s30   ;;  %s2217_s30 = sphi %s2281_s30, %s2713_s30   ;;  %s2213_s29 = sphi %s2279_s29, %s2717_s29   ;;  %s2209_s28 = sphi %s2277_s28, %s2716_s28   ;;  %s2205_s27 = sphi %s2275_s27, %s2715_s27  }
   0xf   : > { %2679 = sst [smem:[#allocation20_spill]] %s2217_s30  ;;  %s1546_s10 = sadd.s32 4294967294, %s2217_s30  }
  0x10   : > { %s2300_s11 = sadd.s32 1, %s2217_s30   ;;  %s36_s12 = sadd.s32 1, %s2213_s29 }
  0x11   : > { %2680 = sst [smem:[#allocation21_spill]] %s2300_s11  ;;  %s33_s13 = ssub.s32 %s2217_s30, %s2300_s11 }
  0x12   : > { %p43_p0 = scmp.ne.s32.totalorder %s2213_s29, %s2209_s28  ;;  %p34_p1 = scmp.eq.s32.totalorder %s33_s13, 0 }
  0x13   : > { %p44_p2 = scmp.eq.s32.totalorder %s2217_s30, 0  ;;  %p49_p3 = scmp.ne.s32.totalorder %s2209_s28, %s2205_s27 }
  0x14   : > { %p2657_p4 = scmp.eq.s32.totalorder %s2296_s9, 0  ;;  %p230_p7 = scmp.eq.s32.totalorder %s2296_s9, 1 }
  0x15   : > { %s2312_s14 = scalar_select %p34_p1, %s2213_s29, %s36_s12  }
  0x16   : > { %p2314_p5 = por %p44_p2, %p43_p0  ;;  %p2320_p6 = por %p2657_p4, %p49_p3 }
  0x17   : > { %2681 = sst [smem:[#allocation22_spill]] %s2312_s14  ;;  %p236_p8 = scmp.eq.s32.totalorder %s1546_s10, 1 }
  0x18   : > { %s2683_s16 = scalar_select %p2320_p6, 1, 0 }
  0x19   : > { %p1547_p9 = scmp.ge.s32.totalorder %s2217_s30, 1  ;;  %p243_p10 = scmp.lt.s32.totalorder %s2217_s30, 3 }
  0x1a   : > { %p2327_p11 = por %p230_p7, %p43_p0  ;;  %p2331_p12 = por %p236_p8, %p49_p3 }
  0x1b   : > { %p2335_p13 = pnand %p1547_p9, %p243_p10  ;;  %s2219_s20 = smov [#allocation8]  }
  0x1c   : > { %s2684_s17 = scalar_select %p2327_p11, 1, 0 }
  0x1d   : > { %s2685_s18 = scalar_select %p2331_p12, 1, 0 }
  0x1e   : > { %s2687_s19 = scalar_select %p2335_p13, 1, 0 }
  0x1f   : > { %2686 = sst [smem:[#allocation23_spill]] %s2685_s18  ;;  %p1832_p1 = pneg %p2335_p13 }
  0x20   : > { %s255_s21 = sshll.u32 %s2219_s20, 4  ;;  %p1859_p3 = scmp.lt.s32.totalorder %s2217_s30, 2  ;;  %s256_s21 = int_to_ptr.vmem [resolvable:$true] %s255_s21 }
  0x21   : > { %p2343_p2 = pnand %p1832_p1, %p2657_p4  ;;  %s2659_s23 = sand.u32 1, %s2213_s29  }
  0x22   : > { %s2352_s24 = sshll.u32 %s2659_s23, 3  ;;  %s1990_s25 = scalar_lea.vmem %s256_s21, 7168 }
  0x23   : > { %s2688_s22 = scalar_select %p2343_p2, 1, 0 }
  0x24   : > { %p2668_p7 = pneg %p2343_p2  ;;  %p1991_p8 = scmp.ne.s32.totalorder %s256_s21, %s1990_s25 }
  0x25   : > { %p1998_p1 = scmp.lt.s32.totalorder %s256_s21, %s256_s21  ;;  %p1999_p4 = scmp.lt.s32.totalorder %s1990_s25, %s1990_s25 }
  0x26   : > { %p1993_p9 = pnand %p1991_p8, %p2668_p7 }
  0x27   : > { %p2000_p12 = por %p1999_p4, %p1998_p1 }
  0x28   : > { %p1994_p10 = pneg %p1993_p9 }
  0x2a   : > { %p2001_p11 = pnand %p2000_p12, %p1994_p10 }
  0x2c   : > { %2004 = shalt.err (!%p2001_p11)
}
  0x2d   : > { %s2663_s26 = smov 64   ;;  %s2665_s10 = smov 4  }
  0x2e   : > { %s2689_s3 = sld [smem:[#allocation25_spill]]  ;;  %s2368_s20 = sshll.u32 %s2217_s30, 7 }
  0x2f   : > { %p2374_p4 = pnand %p1859_p3, %p2314_p5  ;;  %s322_s23 = sand.u32 1, %s2217_s30  }
  0x30   : > { %s2691_s1 = sld [smem:[#allocation24_spill]]  ;;  %s2388_s15 = scalar_lea.sflag [#allocation6], %s322_s23 }
  0x31   : > { %p2394_p11 = pneg %p2374_p4 }
  0x34   : > { %1835 = dma.hbm_to_vmem [thread:$0]  (!%p2343_p2), %s2689_s3, 7168, %s256_s21, [#allocation9], %s2663_s26, %s2663_s26, %s2665_s10  }
  0x35   : > { %s326_s21 = scalar_lea.vmem [#allocation5], %s2352_s24 }
  0x36   : > { %s2383_s18 = scalar_lea.hbm %s2691_s1, %s2368_s20  ;;  %s333_s12 = sshll.u32 %s326_s21, 4  ;;  %s2386_s12 = int_to_ptr.vmem [resolvable:$true] %s333_s12 }
  0x37   : > { %s2005_s13 = scalar_lea.hbm %s2383_s18, 128  ;;  %s2010_s10 = scalar_lea.hbm %s2691_s1, 256 }
  0x38   : > { %p2006_p5 = scmp.ne.s32.totalorder %s2383_s18, %s2005_s13  ;;  %p2011_p8 = scmp.lt.s32.totalorder %s2383_s18, %s2691_s1 }
  0x39   : > { %p2012_p9 = scmp.lt.s32.totalorder %s2010_s10, %s2005_s13 }
  0x3a   : > { %p2008_p12 = pnand %p2394_p11, %p2006_p5 }
  0x3b   : > { %p2013_p10 = por %p2012_p9, %p2011_p8 }
  0x3c   : > { %p2009_p3 = pneg %p2008_p12 }
  0x3e   : > { %p2014_p1 = pnand %p2013_p10, %p2009_p3 }
  0x40   : > { %2017 = shalt.err (!%p2014_p1)
}
  0x41   : > { %s2018_s23 = scalar_lea.vmem %s2386_s12, 128  ;;  %s2222_s30 = smov [#allocation5]  }
  0x42   : > { %p2019_p0 = scmp.ne.s32.totalorder %s2386_s12, %s2018_s23  ;;  %s2023_s11 = sshll.u32 %s2222_s30, 4  ;;  %s2024_s11 = int_to_ptr.vmem [resolvable:$false] %s2023_s11 }
  0x43   : > { %s2025_s14 = scalar_lea.vmem %s2024_s11, 256  ;;  %p2026_p7 = scmp.lt.s32.totalorder %s2386_s12, %s2024_s11 }
  0x44   : > { %p2021_p5 = pnand %p2019_p0, %p2394_p11  ;;  %p2027_p6 = scmp.lt.s32.totalorder %s2025_s14, %s2018_s23 }
  0x46   : > { %p2022_p12 = pneg %p2021_p5  ;;  %p2028_p13 = por %p2027_p6, %p2026_p7 }
  0x48   : > { %p2029_p2 = pnand %p2028_p13, %p2022_p12 }
  0x4a   : > { %2032 = shalt.err (!%p2029_p2)
}
  0x4b   : > { %s2693_s3 = smov 4   ;;  %s2694_s10 = smov 64  }
  0x4c   : > { %1848 = dma.hbm_to_vmem [thread:$0]  (!%p2374_p4), %s2383_s18, 128, %s2386_s12, %s2388_s15, %s2694_s10, %s2694_s10, %s2693_s3  }
  0x4d   : > { %s2223_s13 = smov [#allocation10]   ;;  %s2224_s30 = smov [#allocation11]  }
  0x4e   : > { %s271_s21 = sshll.u32 %s2223_s13, 4  ;;  %s284_s1 = sshll.u32 %s2224_s30, 4  ;;  %s272_s21 = int_to_ptr.vmem [resolvable:$true] %s271_s21  ;;  %s285_s1 = int_to_ptr.vmem [resolvable:$true] %s284_s1 }
  0x4f   : > { %s2044_s11 = scalar_lea.vmem %s272_s21, 1024  ;;  %p2695_p6 = scmp.ne.s32.totalorder %s2688_s22, 0 }
  0x50   : > { %p2045_p0 = scmp.ne.s32.totalorder %s272_s21, %s2044_s11  ;;  %p2052_p3 = scmp.lt.s32.totalorder %s272_s21, %s272_s21 }
  0x51   : > { %p2696_p13 = pneg %p2695_p6  ;;  %p2053_p8 = scmp.lt.s32.totalorder %s2044_s11, %s2044_s11 }
  0x53   : > { %p2047_p2 = pnand %p2045_p0, %p2696_p13  ;;  %p2054_p9 = por %p2053_p8, %p2052_p3 }
  0x55   : > { %p2048_p7 = pneg %p2047_p2 }
  0x57   : > { %p2055_p10 = pnand %p2054_p9, %p2048_p7 }
  0x59   : > { %2058 = shalt.err (!%p2055_p10)
}
  0x5a   : > { %s2697_s5 = sld [smem:[#allocation26_spill]]  ;;  %s2070_s23 = scalar_lea.vmem %s285_s1, 1024 }
  0x5b   : > { %p2071_p1 = scmp.ne.s32.totalorder %s285_s1, %s2070_s23  ;;  %p2698_p5 = pmov %p2696_p13 }
  0x5c   : > { %p2078_p13 = scmp.lt.s32.totalorder %s285_s1, %s285_s1  ;;  %p2079_p2 = scmp.lt.s32.totalorder %s2070_s23, %s2070_s23 }
  0x5d   : > { %p2073_p12 = pnand %p2071_p1, %p2698_p5 }
  0x5e   : > { %p2080_p7 = por %p2079_p2, %p2078_p13 }
  0x5f   : > { %p2074_p0 = pneg %p2073_p12 }
  0x60   : > { %1838 = dma.hbm_to_vmem [thread:$0]  (!%p2695_p6), %s2697_s5, 1024, %s272_s21, [#allocation9], %s2694_s10, %s2694_s10, %s2693_s3  }
  0x61   : > { %p2081_p3 = pnand %p2080_p7, %p2074_p0 }
  0x63   : > { %2084 = shalt.err (!%p2081_p3)
}
  0x64   : > { %s2699_s6 = sld [smem:[#allocation27_spill]]  ;;  %s2446_s11 = scalar_lea.hbm %s2648_s0, %s2368_s20 }
  0x65   : > { %s305_s22 = scalar_lea.vmem [#allocation2], %s2352_s24  ;;  %s2455_s14 = scalar_lea.hbm %s2650_s2, %s2368_s20 }
  0x66   : > { %s312_s18 = sshll.u32 %s305_s22, 4  ;;  %s2700_s13 = sand.u32 1, %s2213_s29   ;;  %s2449_s18 = int_to_ptr.vmem [resolvable:$true] %s312_s18 }
  0x67   : > { %s302_s5 = scalar_lea.sflag [#allocation3], %s2700_s13  ;;  %p2091_p10 = scmp.lt.s32.totalorder %s2446_s11, %s2648_s0 }
  0x6a   : > { %1841 = dma.hbm_to_vmem [thread:$0]  (!%p2695_p6), %s2699_s6, 1024, %s285_s1, [#allocation12], %s2694_s10, %s2694_s10, %s2693_s3  }
  0x6b   : > { %s2085_s1 = scalar_lea.hbm %s2446_s11, 128  ;;  %s2090_s6 = scalar_lea.hbm %s2648_s0, 256 }
  0x6c   : > { %p2086_p6 = scmp.ne.s32.totalorder %s2446_s11, %s2085_s1  ;;  %p2092_p1 = scmp.lt.s32.totalorder %s2090_s6, %s2085_s1 }
  0x6e   : > { %p2088_p8 = pnand %p2086_p6, %p2394_p11  ;;  %p2093_p5 = por %p2092_p1, %p2091_p10 }
  0x70   : > { %p2089_p9 = pneg %p2088_p8 }
  0x72   : > { %p2094_p12 = pnand %p2093_p5, %p2089_p9 }
  0x74   : > { %2097 = shalt.err (!%p2094_p12)
}
  0x75   : > { %s2098_s20 = scalar_lea.vmem %s2449_s18, 128  ;;  %s2225_s12 = smov [#allocation2]  }
  0x76   : > { %p2099_p0 = scmp.ne.s32.totalorder %s2449_s18, %s2098_s20  ;;  %s2103_s23 = sshll.u32 %s2225_s12, 4  ;;  %s2104_s23 = int_to_ptr.vmem [resolvable:$false] %s2103_s23 }
  0x77   : > { %s2105_s13 = scalar_lea.vmem %s2104_s23, 256  ;;  %p2106_p7 = scmp.lt.s32.totalorder %s2449_s18, %s2104_s23 }
  0x78   : > { %p2101_p13 = pnand %p2099_p0, %p2394_p11  ;;  %p2107_p3 = scmp.lt.s32.totalorder %s2105_s13, %s2098_s20 }
  0x7a   : > { %p2102_p2 = pneg %p2101_p13  ;;  %p2108_p6 = por %p2107_p3, %p2106_p7 }
  0x7c   : > { %p2109_p8 = pnand %p2108_p6, %p2102_p2 }
  0x7e   : > { %2112 = shalt.err (!%p2109_p8)
}
  0x7f   : > { %1845 = dma.hbm_to_vmem [thread:$0]  (!%p2374_p4), %s2446_s11, 128, %s2449_s18, %s302_s5, %s2694_s10, %s2694_s10, %s2693_s3  }
  0x80   : > { %s347_s6 = scalar_lea.vmem [#allocation7], %s2352_s24  ;;  %s2113_s1 = scalar_lea.hbm %s2455_s14, 128 }
  0x81   : > { %s354_s27 = sshll.u32 %s347_s6, 4  ;;  %p2114_p9 = scmp.ne.s32.totalorder %s2455_s14, %s2113_s1  ;;  %s355_s27 = int_to_ptr.vmem [resolvable:$true] %s354_s27 }
  0x82   : > { %s2118_s22 = scalar_lea.hbm %s2650_s2, 256  ;;  %p2119_p5 = scmp.lt.s32.totalorder %s2455_s14, %s2650_s2 }
  0x83   : > { %p2116_p10 = pnand %p2114_p9, %p2394_p11  ;;  %p2120_p12 = scmp.lt.s32.totalorder %s2118_s22, %s2113_s1 }
  0x85   : > { %p2117_p1 = pneg %p2116_p10  ;;  %p2121_p0 = por %p2120_p12, %p2119_p5 }
  0x87   : > { %p2122_p13 = pnand %p2121_p0, %p2117_p1 }
  0x89   : > { %2125 = shalt.err (!%p2122_p13)
}
  0x8a   : > { %s2126_s5 = scalar_lea.vmem %s355_s27, 128  ;;  %s2226_s24 = smov [#allocation7]  }
  0x8b   : > { %p2127_p2 = scmp.ne.s32.totalorder %s355_s27, %s2126_s5  ;;  %s2131_s11 = sshll.u32 %s2226_s24, 4  ;;  %s2132_s11 = int_to_ptr.vmem [resolvable:$false] %s2131_s11 }
  0x8c   : > { %s2133_s18 = scalar_lea.vmem %s2132_s11, 256  ;;  %p2134_p6 = scmp.lt.s32.totalorder %s355_s27, %s2132_s11 }
  0x8d   : > { %p2129_p7 = pnand %p2127_p2, %p2394_p11  ;;  %p2135_p8 = scmp.lt.s32.totalorder %s2133_s18, %s2126_s5 }
  0x8f   : > { %p2130_p3 = pneg %p2129_p7  ;;  %p2136_p9 = por %p2135_p8, %p2134_p6 }
  0x91   : > { %p2137_p10 = pnand %p2136_p9, %p2130_p3 }
  0x93   : > { %2140 = shalt.err (!%p2137_p10)
}
  0x94   : > { %1851 = dma.hbm_to_vmem [thread:$0]  (!%p2374_p4), %s2455_s14, 128, %s355_s27, %s2388_s15, %s2694_s10, %s2694_s10, %s2693_s3  }
  0x95   : > { %p2701_p11 = scmp.ne.s32.totalorder %s2687_s19, 0 }
  0x96   : > { %s2506_s26 = sand.u32 (!%p2701_p11), 1, %s2209_s28   ;;  %p2702_p1 = scmp.ne.s32.totalorder (!%p2701_p11), %s2683_s16, 0 }
  0x97   : > { %366 = sbr.rel (%p2701_p11) target bundleno = 709 (0x2c5), region = 52  ;;  %s2509_s23 = sshll.u32 (!%p2701_p11), %s2506_s26, 3 }
  0x98   : > { %s369_s13 = scalar_lea.sflag (!%p2701_p11), [#allocation3], %s2506_s26  ;;  %s372_s25 = scalar_lea.vmem (!%p2701_p11), [#allocation2], %s2509_s23 }
  0x9c   : > { %2184 = dma.done.wait (%p2702_p1), %s369_s13, 128  }
  0x9d   : > { %2186 = vsyncadd (%p2702_p1), %s369_s13, 4294967168  ;;  %s377_s19 = sand.u32 1, %s2296_s9   ;;  %s381_s3 = scalar_lea.vmem [#allocation5], %s2509_s23 }
  0x9e   : > { %s378_s15 = scalar_lea.sflag [#allocation6], %s377_s19 }
  0x9f   : > { %2188 = dma.done.wait (%p2702_p1), %s378_s15, 256  }
  0xa0   : > { %2190 = vsyncadd (%p2702_p1), %s378_s15, 4294967040  ;;  %s390_s10 = scalar_lea.vmem [#allocation7], %s2509_s23  ;;  %p2703_p4 = scmp.eq.s32.totalorder %s2296_s9, 0 }
  0xa2   : > { %2192 = dma.done.wait (%p2703_p4), [#allocation9], 8192   ;;  %p2704_p5 = pmov %p2703_p4 }
  0xa3   : > { %p2705_p12 = pmov %p2703_p4 }
  0xa4   : > { %2194 = vsyncadd (%p2704_p5), [#allocation9], 4294959104 }
  0xa5   : > { %2196 = dma.done.wait (%p2705_p12), [#allocation12], 1024   ;;  %p2706_p0 = pmov %p2703_p4 }
  0xa6   : > { %v1903_v0 = vld [vmem:[#allocation8 + $0x78] sm:$0xff]   ;;  %v1907_v4 = vld [vmem:[#allocation8 + $0x70] sm:$0xff]   ;;  %v1911_v8 = vld [vmem:[#allocation8 + $0x68] sm:$0xff]   ;;  %v463_v27 = vlaneseq  ;;  %v2227_v45 = vmov 0.0   ;;  %vm488_vm2 = vcmask 1041408   ;;  %vm509_vm8 = vcmask 1046528  }
  0xa7   : > { %2198 = vsyncadd (%p2706_p0), [#allocation12], 4294966272  ;;  %v1904_v1 = vld [vmem:[#allocation8 + $0xf8] sm:$0xff]   ;;  %1659 = vmatprep.subr.bf16.mxu0 %v1903_v0  ;;  %v1908_v5 = vld [vmem:[#allocation8 + $0xf0] sm:$0xff]   ;;  %vm489_vm3 = vsmask.f32 1280 }
  0xa8   : > { %v1905_v2 = vld [vmem:[#allocation8 + $0x38] sm:$0xff]   ;;  %1681 = vmatprep.subr.bf16.mxu1 %v1904_v1  ;;  %v1909_v6 = vld [vmem:[#allocation8 + $0x30] sm:$0xff]   ;;  %v1912_v9 = vld [vmem:[#allocation8 + $0xe8] sm:$0xff]   ;;  %v2532_v32 = vshrl.u32 %v463_v27, 7  ;;  %vm493_vm5 = vsmask.f32 7424 }
  0xa9   : > { %v1906_v3 = vld [vmem:[#allocation8 + $0xb8] sm:$0xff]   ;;  %1660 = vmatpush3.bf16.msra.mxu0 %v1905_v2  ;;  %v1910_v7 = vld [vmem:[#allocation8 + $0xb0] sm:$0xff]   ;;  %v1913_v10 = vld [vmem:[#allocation8 + $0x28] sm:$0xff]   ;;  %vm514_vm6 = vsmask.f32 6400  ;;  %vm2228_vm9 = vmmov 0  }
  0xaa   : > { %1682 = vmatpush3.bf16.msra.mxu1 %v1906_v3  ;;  %1661 = vmatprep.subr.bf16.mxu0 %v1907_v4  ;;  %v1914_v11 = vld [vmem:[#allocation8 + $0xa8] sm:$0xff]   ;;  %v1915_v12 = vld [vmem:[#allocation8 + $0x60] sm:$0xff]   ;;  %v1919_v16 = vld [vmem:[#allocation8 + $0x58] sm:$0xff]   ;;  %v2541_v44 = vadd.s32 8, %v2532_v32  ;;  %vm466_vm0 = vcmp.gt.s32.totalorder %v2532_v32, 0  ;;  %vm525_vm10 = vcmask 1045504  }
  0xab   : > { %1683 = vmatprep.subr.bf16.mxu1 %v1908_v5  ;;  %v1916_v13 = vld [vmem:[#allocation8 + $0xe0] sm:$0xff]   ;;  %v1920_v17 = vld [vmem:[#allocation8 + $0xd8] sm:$0xff]   ;;  %v1923_v20 = vld [vmem:[#allocation8 + $0x50] sm:$0xff]   ;;  %vm530_vm7 = vsmask.f32 5376  ;;  %vm539_vm11 = vcmask 1044480  }
  0xac   : > { %v1917_v14 = vld [vmem:[#allocation8 + $0x20] sm:$0xff]   ;;  %v1921_v18 = vld [vmem:[#allocation8 + $0x18] sm:$0xff]   ;;  %v1924_v21 = vld [vmem:[#allocation8 + $0xd0] sm:$0xff]   ;;  %vm469_vm1 = vcmp.lt.s32.totalorder %v2541_v44, 9  ;;  %s1641_s1 = sshll.u32 %s2296_s9, 4  ;;  %s443_s21 = scalar_lea.vmem [#allocation13], %s2506_s26 }
  0xad   : > { %1662 = vmatpush3.bf16.msra.mxu0 %v1909_v6  ;;  %v1918_v15 = vld [vmem:[#allocation8 + $0xa0] sm:$0xff]   ;;  %v1922_v19 = vld [vmem:[#allocation8 + $0x98] sm:$0xff]   ;;  %v1925_v22 = vld [vmem:[#allocation8 + $0x10] sm:$0xff]   ;;  %s1408_s30 = sshll.u32 %s443_s21, 4  ;;  %s1406_s12 = scalar_lea.hbm %s2656_s8, %s1641_s1  ;;  %s1409_s30 = int_to_ptr.vmem [resolvable:$true] %s1408_s30 }
  0xae   : > { %1684 = vmatpush3.bf16.msra.mxu1 %v1910_v7  ;;  %1663 = vmatprep.subr.bf16.mxu0 %v1911_v8  ;;  %v1926_v23 = vld [vmem:[#allocation8 + $0x90] sm:$0xff]   ;;  %v1927_v24 = vld [vmem:[#allocation8 + $0x48] sm:$0xff]   ;;  %v1931_v29 = vld [vmem:[#allocation8 + $0x40] sm:$0xff]   ;;  %s1396_s5 = scalar_lea.sflag [#allocation4], %s2506_s26  ;;  %s2141_s24 = scalar_lea.vmem %s1409_s30, 16 }
  0xaf   : > { %1685 = vmatprep.subr.bf16.mxu1 %v1912_v9  ;;  %v1928_v25 = vld [vmem:[#allocation8 + $0xc8] sm:$0xff]   ;;  %v1932_v30 = vld [vmem:[#allocation8 + $0xc0] sm:$0xff]   ;;  %v1648_v34 = vld [vmem:[%s372_s25] sm:$0xff]   ;;  %p2142_p13 = scmp.ne.s32.totalorder %s1409_s30, %s2141_s24  ;;  %p2707_p2 = scmp.ne.s32.totalorder %s2684_s17, 0 }
  0xb0   : > { %v1929_v26 = vld [vmem:[#allocation8 + $0x8] sm:$0xff]   ;;  %v1933_v31 = vld [vmem:[#allocation8] sm:$0xff]   ;;  %v1656_v36 = vld [vmem:[%s390_s10] sm:$0xff]   ;;  %v1649_v37 = vunpack.c.l.bf16 %v1648_v34  ;;  %v1650_v38 = vunpack.c.h.bf16 %v1648_v34  ;;  %s2229_s11 = smov [#allocation13]  }
  0xb1   : > { %1664 = vmatpush3.bf16.msra.mxu0 %v1913_v10  ;;  %v1930_v28 = vld [vmem:[#allocation8 + $0x88] sm:$0xff]   ;;  %v1934_v33 = vld [vmem:[#allocation8 + $0x80] sm:$0xff]   ;;  %v1935_v41 = vld [vmem:[#allocation8 + $0x178] sm:$0xff]   ;;  %v1657_v42 = vunpack.c.l.bf16 %v1656_v36  ;;  %v1658_v43 = vunpack.c.h.bf16 %v1656_v36  ;;  %p2143_p7 = pnand %p2142_p13, %p2707_p2  ;;  %s2145_s18 = sshll.u32 %s2229_s11, 4  ;;  %s2146_s18 = int_to_ptr.vmem [resolvable:$false] %s2145_s18 }
  0xb2   : > { %1686 = vmatpush3.bf16.msra.mxu1 %v1914_v11  ;;  %1665 = vmatprep.subr.bf16.mxu0 %v1915_v12  ;;  %v1652_v35 = vld [vmem:[%s381_s3] sm:$0xff]   ;;  %vm490_vm4 = vmand %vm488_vm2, %vm489_vm3  ;;  %v1936_v10 = vld [vmem:[#allocation8 + $0x138] sm:$0xff]   ;;  %s2147_s9 = scalar_lea.vmem %s2146_s18, 32  ;;  %p2148_p6 = scmp.lt.s32.totalorder %s1409_s30, %s2146_s18 }
  0xb3   : > { %1687 = vmatprep.subr.bf16.mxu1 %v1916_v13  ;;  %v1653_v39 = vunpack.c.l.bf16 %v1652_v35  ;;  %v1654_v40 = vunpack.c.h.bf16 %v1652_v35  ;;  %v1946_v34 = vld [vmem:[#allocation8 + $0x1a0] sm:$0xff]   ;;  %v1947_v35 = vld [vmem:[#allocation8 + $0x158] sm:$0xff]   ;;  %v1384_v44 = vld [vmem:[%s2655_s7] sm:$0x1]  ;;  %p2144_p3 = pneg %p2143_p7  ;;  %p2149_p8 = scmp.lt.s32.totalorder %s2147_s9, %s2141_s24 }
  0xb4   : > { %v1948_v36 = vld [vmem:[#allocation8 + $0x118] sm:$0xff]  }
  0xb5   : > { %1666 = vmatpush3.bf16.msra.mxu0 %v1917_v14  ;;  %v453_v46 = vadd.f32 %v1653_v39, %v1649_v37  ;;  %v454_v47 = vadd.f32 %v1654_v40, %v1650_v38  ;;  %v1937_v14 = vld [vmem:[#allocation8 + $0x1b8] sm:$0xff]   ;;  %v1950_v38 = vld [vmem:[#allocation8 + $0x150] sm:$0xff]   ;;  %p2150_p9 = por %p2149_p8, %p2148_p6 }
  0xb6   : > { %1688 = vmatpush3.bf16.msra.mxu1 %v1918_v15  ;;  %1667 = vmatprep.subr.bf16.mxu0 %v1919_v16  ;;  %v1949_v37 = vld [vmem:[#allocation8 + $0x198] sm:$0xff]   ;;  %v1951_v39 = vld [vmem:[#allocation8 + $0x110] sm:$0xff]  }
  0xb7   : > { %1689 = vmatprep.subr.bf16.mxu1 %v1920_v17  ;;  %v459_v48 = vadd.f32 %v1657_v42, %v453_v46  ;;  %v460_v49 = vadd.f32 %v1658_v43, %v454_v47  ;;  %v1952_v40 = vld [vmem:[#allocation8 + $0x190] sm:$0xff]   ;;  %v1954_v42 = vld [vmem:[#allocation8 + $0x108] sm:$0xff]   ;;  %v1956_v46 = vld [vmem:[#allocation8 + $0x140] sm:$0xff]   ;;  %p2151_p10 = pnand %p2150_p9, %p2144_p3 }
  0xb8   : > { %v1955_v43 = vld [vmem:[#allocation8 + $0x188] sm:$0xff]   ;;  %v1957_v47 = vld [vmem:[#allocation8 + $0x100] sm:$0xff]  }
  0xb9   : > { %1668 = vmatpush3.bf16.msra.mxu0 %v1921_v18  ;;  %v2546_v50 = vmul.f32 0.33333334, %v459_v48  ;;  %v462_v51 = vmul.f32 0.33333334, %v460_v49  ;;  %v1938_v18 = vld [vmem:[#allocation8 + $0x170] sm:$0xff]  }
  0xba   : > { %1690 = vmatpush3.bf16.msra.mxu1 %v1922_v19  ;;  %1669 = vmatprep.subr.bf16.mxu0 %v1923_v20 }
  0xbb   : > { %1691 = vmatprep.subr.bf16.mxu1 %v1924_v21  ;;  %v476_v52 = vsel %vm466_vm0, %v2546_v50, 0.0  ;;  %v477_v53 = vsel %vm469_vm1, %v462_v51, 0.0  ;;  %v1958_v51 = vld [vmem:[#allocation8 + $0x180] sm:$0xff]  }
  0xbc   : > { %v478_v54 = vpack.c.bf16 %v477_v53, %v476_v52 }
  0xbd   : > { %1670 = vmatpush3.bf16.msra.mxu0 %v1925_v22  ;;  %v1939_v22 = vld [vmem:[#allocation8 + $0x130] sm:$0xff]  }
  0xbe   : > { %1692 = vmatpush3.bf16.msra.mxu1 %v1926_v23  ;;  %1671 = vmatprep.subr.bf16.mxu0 %v1927_v24  ;;  %v480_v55 = vshrl.u32 %v478_v54, 16  ;;  %v483_v56 = vshll.u32 %v478_v54, 16  ;;  %v1940_v23 = vld [vmem:[#allocation8 + $0x1b0] sm:$0xff]  }
  0xbf   : > { %1693 = vmatprep.subr.bf16.mxu1 %v1928_v25 }
  0xc0   : > { %v482_v57 = vrot.slane %v480_v55, 6  ;;  %v485_v58 = vrot.slane %v483_v56, 7  ;;  %v1959_v56 = vld [vmem:[#allocation10 + $0x38] sm:$0xff]  }
  0xc1   : > { %1672 = vmatpush3.bf16.msra.mxu0 %v1929_v26  ;;  %v1941_v26 = vld [vmem:[#allocation8 + $0x168] sm:$0xff]  }
  0xc2   : > { %1694 = vmatpush3.bf16.msra.mxu1 %v1930_v28  ;;  %1673 = vmatprep.subr.bf16.mxu0 %v1931_v29  ;;  %v486_v59 = vor.u32 %v485_v58, %v482_v57  ;;  %v1942_v28 = vld [vmem:[#allocation8 + $0x128] sm:$0xff]   ;;  %v1960_v57 = vld [vmem:[#allocation10 + $0x30] sm:$0xff]   ;;  %v1961_v58 = vld [vmem:[#allocation11 + $0x38] sm:$0xff]  }
  0xc3   : > { %1695 = vmatprep.subr.bf16.mxu1 %v1932_v30  ;;  %v1943_v29 = vld [vmem:[#allocation8 + $0x1a8] sm:$0xff]   ;;  %v1944_v30 = vld [vmem:[#allocation8 + $0x160] sm:$0xff]  }
  0xc4   : > { %v2553_v60 = vsel %vm490_vm4, 0, %v486_v59  ;;  %v2555_v61 = vsel %vm490_vm4, %v486_v59, 0  ;;  %v1962_v59 = vld [vmem:[#allocation10 + $0x28] sm:$0xff]  }
  0xc5   : > { %1674 = vmatpush3.bf16.msra.mxu0 %v1933_v31  ;;  %v495_v62 = vshrl.u32 %v2553_v60, 16  ;;  %v497_v63 = vshll.u32 %v2553_v60, 16  ;;  %v502_v0 = vshll.u32 %v2555_v61, 16  ;;  %v518_v1 = vshrl.u32 %v2555_v61, 16 }
  0xc6   : > { %1696 = vmatpush3.bf16.msra.mxu1 %v1934_v33  ;;  %1703 = vmatprep.subr.bf16.mxu0 %v1935_v41  ;;  %v510_v2 = vrot.slane %v2553_v60, 1  ;;  %v511_v3 = vrot.slane %v2555_v61, 1  ;;  %v1945_v33 = vld [vmem:[#allocation8 + $0x120] sm:$0xff]   ;;  %v1953_v41 = vld [vmem:[#allocation8 + $0x148] sm:$0xff]   ;;  %v526_v48 = vrot.slane %v2553_v60, 2  ;;  %v527_v49 = vrot.slane %v2555_v61, 2 }
  0xc7   : > { %1752 = vmatprep.subr.bf16.mxu1 %v2227_v45  ;;  %v499_v4 = vrot.slane %v497_v63, 1  ;;  %v504_v5 = vrot.slane %v502_v0, 1  ;;  %v515_v6 = vrot.slane %v495_v62, 1  ;;  %v516_v7 = vrot.slane %v497_v63, 2 }
  0xc8   : > { %v520_v8 = vrot.slane %v518_v1, 1  ;;  %v521_v9 = vrot.slane %v502_v0, 2  ;;  %v531_v15 = vrot.slane %v495_v62, 2  ;;  %v512_v17 = vsel %vm509_vm8, %v510_v2, %v511_v3  ;;  %v1969_v2 = vld [vmem:[#allocation11 + $0x18] sm:$0xff]   ;;  %v1970_v3 = vld [vmem:[#allocation10 + $0x8] sm:$0xff]  }
  0xc9   : > { %v500_v11 = vor.u32 %v499_v4, %v495_v62  ;;  %v517_v12 = vor.u32 %v516_v7, %v515_v6  ;;  %v532_v19 = vrot.slane %v497_v63, 3  ;;  %v534_v21 = vrot.slane %v518_v1, 2  ;;  %v1965_v62 = vld [vmem:[#allocation11 + $0x28] sm:$0xff]   ;;  %v1966_v63 = vld [vmem:[#allocation10 + $0x18] sm:$0xff]   ;;  %v1968_v1 = vld [vmem:[#allocation10 + $0x10] sm:$0xff]  }
  0xca   : > { %v522_v13 = vor.u32 %v521_v9, %v520_v8  ;;  %v535_v25 = vrot.slane %v502_v0, 3  ;;  %v540_v52 = vrot.slane %v2553_v60, 3  ;;  %v541_v53 = vrot.slane %v2555_v61, 3  ;;  %v1964_v61 = vld [vmem:[#allocation10 + $0x20] sm:$0xff]   ;;  %v1971_v4 = vld [vmem:[#allocation11 + $0x10] sm:$0xff]   ;;  %v1973_v6 = vld [vmem:[#allocation11 + $0x8] sm:$0xff]  }
  0xcb   : > { %v505_v16 = vsel %vm493_vm5, %v500_v11, %v504_v5  ;;  %v533_v24 = vor.u32 %v532_v19, %v531_v15  ;;  %v528_v54 = vsel %vm525_vm10, %v526_v48, %v527_v49  ;;  %v1967_v0 = vld [vmem:[#allocation11 + $0x20] sm:$0xff]   ;;  %v1174_v7 = vpack.c.bf16 %v2546_v50, %v2546_v50 }
  0xcc   : > { %1031 = vmatprep.mubr.bf16.mxu0 %v505_v16  ;;  %v523_v20 = vsel %vm514_vm6, %v517_v12, %v522_v13  ;;  %v536_v27 = vor.u32 %v535_v25, %v534_v21  ;;  %v542_v55 = vsel %vm539_vm11, %v540_v52, %v541_v53  ;;  %v1972_v5 = vld [vmem:[#allocation10] sm:$0xff]   ;;  %v1568_v16 = vld [vmem:[%s2652_s4] ss:$0 sm:$0xff] }
  0xcd   : > { %1032 = vmatmul.mubr.bf16.vlgmr.msra.gmra.mxu0 %v2553_v60  ;;  %1072 = vmatprep.mubr.bf16.mxu1 %v523_v20  ;;  %v1963_v60 = vld [vmem:[#allocation11 + $0x30] sm:$0xff]   ;;  %v1974_v8 = vld [vmem:[#allocation11] sm:$0xff]  }
  0xce   : > { %1073 = vmatmul.mubr.bf16.vlgmr.msra.gmra.mxu1 %v512_v17  ;;  %1704 = vmatpush3.bf16.msra.mxu0 %v1936_v10  ;;  %v537_v31 = vsel %vm530_vm7, %v533_v24, %v536_v27 }
  0xcf   : > { %1753 = vmatpush3.bf16.msra.mxu1 %v1937_v14  ;;  %1705 = vmatprep.subr.bf16.mxu0 %v1938_v18 }
  0xd0   : > { %1754 = vmatprep.subr.bf16.mxu1 %v2227_v45  ;;  %1768 = vmatprep.mubr.msk.bf16.mxu1 %vm2228_vm9, %v2227_v45 }
  0xd1   : > { %1113 = vmatprep.mubr.bf16.mxu0 %v537_v31 }
  0xd2   : > { %1706 = vmatpush3.bf16.msra.mxu0 %v1939_v22 }
  0xd3   : > { %1755 = vmatpush3.bf16.msra.mxu1 %v1940_v23  ;;  %1707 = vmatprep.subr.bf16.mxu0 %v1941_v26 }
  0xd4   : > { %1756 = vmatprep.subr.bf16.mxu1 %v2227_v45 }
  0xd6   : > { %1708 = vmatpush3.bf16.msra.mxu0 %v1942_v28 }
  0xd7   : > { %1757 = vmatpush3.bf16.msra.mxu1 %v1943_v29  ;;  %1709 = vmatprep.subr.bf16.mxu0 %v1944_v30 }
  0xd8   : > { %1758 = vmatprep.subr.bf16.mxu1 %v2227_v45 }
  0xda   : > { %1710 = vmatpush3.bf16.msra.mxu0 %v1945_v33 }
  0xdb   : > { %1759 = vmatpush3.bf16.msra.mxu1 %v1946_v34  ;;  %1711 = vmatprep.subr.bf16.mxu0 %v1947_v35 }
  0xdc   : > { %1760 = vmatprep.subr.bf16.mxu1 %v2227_v45 }
  0xde   : > { %1712 = vmatpush3.bf16.msra.mxu0 %v1948_v36 }
  0xdf   : > { %1761 = vmatpush3.bf16.msra.mxu1 %v1949_v37  ;;  %1713 = vmatprep.subr.bf16.mxu0 %v1950_v38 }
  0xe0   : > { %1762 = vmatprep.subr.bf16.mxu1 %v2227_v45 }
  0xe2   : > { %1714 = vmatpush3.bf16.msra.mxu0 %v1951_v39 }
  0xe3   : > { %1763 = vmatpush3.bf16.msra.mxu1 %v1952_v40  ;;  %1715 = vmatprep.subr.bf16.mxu0 %v1953_v41 }
  0xe4   : > { %1764 = vmatprep.subr.bf16.mxu1 %v2227_v45 }
  0xe6   : > { %1716 = vmatpush3.bf16.msra.mxu0 %v1954_v42 }
  0xe7   : > { %1765 = vmatpush3.bf16.msra.mxu1 %v1955_v43  ;;  %1717 = vmatprep.subr.bf16.mxu0 %v1956_v46 }
  0xe8   : > { %1766 = vmatprep.subr.bf16.mxu1 %v2227_v45 }
  0xea   : > { %1718 = vmatpush3.bf16.msra.mxu0 %v1957_v47 }
  0xeb   : > { %1767 = vmatpush3.bf16.msra.mxu1 %v1958_v51  ;;  %1772 = vmatprep.subr.bf16.mxu0 %v2227_v45 }
  0xec   : > { %1792 = vmatprep.subr.bf16.mxu1 %v2227_v45 }
  0xed   : > { %1114 = vmatmul.mubr.bf16.vlgmr.msra.gmra.mxu0 %v528_v54 }
  0xee   : > { %1769 = vmatmul.mubr.bf16.vlgmr.msra.gmra.mxu1 %v542_v55  ;;  %1788 = vmatprep.mubr.msk.bf16.mxu0 %vm2228_vm9, %v2227_v45 }
  0xef   : > { %1808 = vmatprep.mubr.msk.bf16.mxu1 %vm2228_vm9, %v2227_v45  ;;  %1793 = vmatpush3.bf16.msra.mxu1 %v1959_v56 }
  0xf0   : > { %1794 = vmatprep.subr.bf16.mxu1 %v2227_v45  ;;  %1773 = vmatpush3.bf16.msra.mxu0 %v1961_v58 }
  0xf1   : > { %1774 = vmatprep.subr.bf16.mxu0 %v2227_v45 }
  0xf3   : > { %1795 = vmatpush3.bf16.msra.mxu1 %v1960_v57 }
  0xf4   : > { %1796 = vmatprep.subr.bf16.mxu1 %v2227_v45  ;;  %1775 = vmatpush3.bf16.msra.mxu0 %v1963_v60 }
  0xf5   : > { %1776 = vmatprep.subr.bf16.mxu0 %v2227_v45 }
  0xf7   : > { %1797 = vmatpush3.bf16.msra.mxu1 %v1962_v59 }
  0xf8   : > { %1798 = vmatprep.subr.bf16.mxu1 %v2227_v45  ;;  %1777 = vmatpush3.bf16.msra.mxu0 %v1965_v62 }
  0xf9   : > { %1778 = vmatprep.subr.bf16.mxu0 %v2227_v45 }
  0xfb   : > { %1799 = vmatpush3.bf16.msra.mxu1 %v1964_v61 }
  0xfc   : > { %1800 = vmatprep.subr.bf16.mxu1 %v2227_v45  ;;  %1779 = vmatpush3.bf16.msra.mxu0 %v1967_v0 }
  0xfd   : > { %1780 = vmatprep.subr.bf16.mxu0 %v2227_v45 }
  0xff   : > { %1801 = vmatpush3.bf16.msra.mxu1 %v1966_v63 }
 0x100   : > { %1802 = vmatprep.subr.bf16.mxu1 %v2227_v45  ;;  %1781 = vmatpush3.bf16.msra.mxu0 %v1969_v2 }
 0x101   : > { %1782 = vmatprep.subr.bf16.mxu0 %v2227_v45 }
 0x103   : > { %1803 = vmatpush3.bf16.msra.mxu1 %v1968_v1 }
 0x104   : > { %1804 = vmatprep.subr.bf16.mxu1 %v2227_v45  ;;  %1783 = vmatpush3.bf16.msra.mxu0 %v1971_v4 }
 0x105   : > { %1784 = vmatprep.subr.bf16.mxu0 %v2227_v45 }
 0x107   : > { %1805 = vmatpush3.bf16.msra.mxu1 %v1970_v3 }
 0x108   : > { %1806 = vmatprep.subr.bf16.mxu1 %v2227_v45  ;;  %1785 = vmatpush3.bf16.msra.mxu0 %v1973_v6 }
 0x109   : > { %1786 = vmatprep.subr.bf16.mxu0 %v2227_v45 }
 0x10b   : > { %1807 = vmatpush3.bf16.msra.mxu1 %v1972_v5 }
 0x10c   : > { %1787 = vmatpush3.bf16.msra.mxu0 %v1974_v8 }
 0x10e   : > { %1809 = vmatmul.mubr.bf16.vlgmr.msra.gmra.mxu1 %v1174_v7 }
 0x18d   : > { %v1675_v9 = vpop.f32.mrf.mxu0 }
 0x18e   : > { %v1697_v10 = vpop.f32.mrf.mxu1 }
 0x18f   : > { %v1676_v11 = vpop.f32.mrf.mxu0 }
 0x190   : > { %v1698_v12 = vpop.f32.mrf.mxu1  ;;  %v1677_v14 = vadd.f32 %v1676_v11, %v1675_v9 }
 0x191   : > { %v1678_v13 = vpop.f32.mrf.mxu0  ;;  %v1699_v18 = vadd.f32 %v1698_v12, %v1697_v10 }
 0x192   : > { %v1700_v15 = vpop.f32.mrf.mxu1  ;;  %v1034_v50 = vadd.f32 %v1677_v14, %v1568_v16 }
 0x193   : > { %v1679_v17 = vpop.f32.mrf.mxu0 }
 0x194   : > { %v1680_v19 = vadd.f32 %v1679_v17, %v1678_v13  ;;  %v1701_v20 = vpop.f32.mrf.mxu1  ;;  %v1075_v23 = vadd.f32 %v1699_v18, %v1034_v50 }
 0x195   : > { %v1702_v25 = vadd.f32 %v1701_v20, %v1700_v15 }
 0x196   : > { %v1037_v24 = vadd.f32 %v1680_v19, %v1568_v16 }
 0x198   : > { %v1078_v33 = vadd.f32 %v1702_v25, %v1037_v24 }
 0x1ad   : > { %v1719_v21 = vpop.f32.mrf.mxu0 }
 0x1ae   : > { %v1156_v22 = vpop.f32.mrf.mxu1 }
 0x1af   : > { %v1720_v45 = vpop.f32.mrf.mxu0 }
 0x1b0   : > { %v1721_v26 = vadd.f32 %v1720_v45, %v1719_v21  ;;  %v1770_v27 = vpop.f32.mrf.mxu1 }
 0x1b1   : > { %v1722_v28 = vpop.f32.mrf.mxu0 }
 0x1b2   : > { %v1116_v29 = vadd.f32 %v1721_v26, %v1075_v23  ;;  %v1159_v30 = vpop.f32.mrf.mxu1 }
 0x1b3   : > { %v1723_v31 = vpop.f32.mrf.mxu0 }
 0x1b4   : > { %v1157_v34 = vadd.f32 %v1156_v22, %v1116_v29  ;;  %v1724_v35 = vadd.f32 %v1723_v31, %v1722_v28  ;;  %v1771_v36 = vpop.f32.mrf.mxu1 }
 0x1b6   : > { %v1119_v37 = vadd.f32 %v1724_v35, %v1078_v33  ;;  %v1163_v38 = vmax.f32 %v1157_v34, 0.0 }
 0x1b8   : > { %v1160_v39 = vadd.f32 %v1159_v30, %v1119_v37  ;;  %v1165_v41 = vsel %vm466_vm0, %v1163_v38, 0.0 }
 0x1ba   : > { %v1164_v40 = vmax.f32 %v1160_v39, 0.0 }
 0x1bc   : > { %v1166_v42 = vsel %vm469_vm1, %v1164_v40, 0.0 }
 0x1bd   : > { %v1167_v43 = vmax.f32 %v1165_v41, %v1166_v42 }
 0x1bf   : > { %v1168_v46 = vrot.slane %v1167_v43, 4 }
 0x1c1   : > { %v1169_v47 = vmax.f32 %v1167_v43, %v1168_v46 }
 0x1c3   : > { %v1170_v48 = vrot.slane %v1169_v47, 2 }
 0x1c5   : > { %v1171_v49 = vmax.f32 %v1169_v47, %v1170_v48 }
 0x1c7   : > { %v1172_v51 = vrot.slane %v1171_v49, 1 }
 0x1c9   : > { %v1173_v52 = vmax.f32 %v1171_v49, %v1172_v51 }
 0x1cb   : > { %v1191_v53 = vpack.c.bf16 %v1173_v52, %v1173_v52 }
 0x1cd   : > { %1789 = vmatmul.mubr.bf16.vlgmr.msra.gmra.mxu0 %v1191_v53 }
 0x1ce   : > { %v1378_v54 = vpop.f32.mrf.mxu1 }
 0x1d0   : > { %v1810_v55 = vpop.f32.mrf.mxu1 }
 0x1d2   : > { %v1381_v56 = vpop.f32.mrf.mxu1 }
 0x1d4   : > { %v1811_v57 = vpop.f32.mrf.mxu1 }
 0x28d   : > { %v1290_v32 = vpop.f32.mrf.mxu0 }
 0x28e   : > { %v1379_v58 = vadd.f32 %v1378_v54, %v1290_v32 }
 0x28f   : > { %v1790_v59 = vpop.f32.mrf.mxu0 }
 0x290   : > { %v1385_v60 = vadd.f32 %v1384_v44, %v1379_v58 }
 0x291   : > { %v1293_v61 = vpop.f32.mrf.mxu0 }
 0x292   : > { %v1386_v62 = vsub.f32 0.0, %v1385_v60 }
 0x293   : > { %v1791_v63 = vpop.f32.mrf.mxu0 }
 0x294   : > { %v1387_v0 = vmul.f32 1.442695, %v1386_v62 }
 0x296   : > { %1975 = vpow2.f32 %v1387_v0 }
 0x2a3   : > { %v1976_v1 = vpop.eup %1975 }
 0x2a4   : > { %v1389_v2 = vadd.f32 1.0, %v1976_v1 }
 0x2a6   : > { %1977 = vrcp.f32 %v1389_v2 }
 0x2b3   : > { %v1978_v3 = vpop.eup %1977 }
 0x2b4   : > { %v1392_v4 = vmax.f32 %v1978_v3, 1e-07 }
 0x2b6   : > { %v1393_v5 = vmin.f32 %v1392_v4, 0.9999999 }
 0x2b8   : > { %1394 = vst [vmem:[%s443_s21] sm:$0x1] %v1393_v5 }
 0x2b9   : > { %2154 = shalt.err (!%p2151_p10)
}
 0x2ba   : > { %s2155_s23 = scalar_lea.hbm %s1406_s12, 16  ;;  %s2159_s25 = scalar_lea.hbm %s2656_s8, 32 }
 0x2bb   : > { %p2156_p11 = scmp.ne.s32.totalorder %s1406_s12, %s2155_s23  ;;  %p2160_p5 = scmp.lt.s32.totalorder %s1406_s12, %s2656_s8 }
 0x2bc   : > { %p2161_p12 = scmp.lt.s32.totalorder %s2159_s25, %s2155_s23 }
 0x2bd   : > { %p2157_p1 = pnand %p2156_p11, %p2707_p2 }
 0x2be   : > { %p2162_p0 = por %p2161_p12, %p2160_p5 }
 0x2bf   : > { %p2158_p4 = pneg %p2157_p1 }
 0x2c1   : > { %p2163_p13 = pnand %p2162_p0, %p2158_p4 }
 0x2c3   : > { %2166 = shalt.err (!%p2163_p13)
}
 0x2c4   : > { %1830 = dma.vmem_to_hbm [thread:$0]  (%p2707_p2), %s1409_s30, 16, %s1406_s12, %s1396_s5  }
 0x2c5 PF: > { %s2708_s3 = sld [smem:[#allocation19_spill]] }
 0x2c6   : > { %s2709_s10 = sld [smem:[#allocation23_spill]] }
 0x2c7   : > { %s2710_s16 = sld [smem:[#allocation20_spill]] }
 0x2cb   : > { %s1420_s14 = sand.u32 1, %s2708_s3  }
 0x2cc   : > { %p2711_p7 = scmp.ne.s32.totalorder %s2709_s10, 0  ;;  %s1421_s6 = scalar_lea.sflag [#allocation4], %s1420_s14 }
 0x2cd   : > { %p2712_p3 = scmp.ge.s32.totalorder %s2710_s16, 2 }
 0x2cf   : > { %p1853_p6 = pnand %p2712_p3, %p2711_p7 }
 0x2d1   : > { %p1854_p8 = pneg %p1853_p6 }
 0x2d3   : > { %2200 = dma.done.wait (%p1854_p8), %s1421_s6, 16  }
 0x2d4   : > { %2202 = vsyncadd (%p1854_p8), %s1421_s6, 4294967280  ;;  %s2713_s30 = sld [smem:[#allocation21_spill]]  ;;  %s2715_s27 = smov %s2209_s28 }
 0x2d5   : > { %s2714_s1 = sld [smem:[#allocation22_spill]]  ;;  %s2716_s28 = smov %s2213_s29 }
 0x2da   : > { %p26_p9 = scmp.ge.s32.totalorder %s2713_s30, 4  }
 0x2db   : > { %s2717_s29 = smov %s2714_s1 }
 0x2dc   :  { %28 = sbr.rel (!%p26_p9) target bundleno = 14 (0xe), region = 133 }
 0x2e1   :  { %1425 = vsyncpa [#allocation3], 1 }
 0x2e2   :  { %1427 = vsyncpa [#allocation3 + $0x1], 1 }
 0x2e3   :  { %1428 = vsyncpa [#allocation6], 1 }
 0x2e4   :  { %1430 = vsyncpa [#allocation6 + $0x1], 1 }
 0x2e5   :  { %1431 = vsyncpa [#allocation9], 1 }
 0x2e6   :  { %1432 = vsyncpa [#allocation12], 1 }
 0x2e7   :  { %1433 = vsyncpa [#allocation4], 1 }
 0x2e8   :  { %1435 = vsyncpa [#allocation4 + $0x1], 1 }

// kernel: tpu_custom_call.1
= control target key start
LH: loop header
LB: loop body
LE: loop exit
PB: predicated region body
PF: predicated region fallthrough
CT: control target
= control target key end

     0   :  { %s2648_s0 = inlined_call_operand.hbm [shape: bf16[2,16,128], index: 0, kind: input, shape index: {}]   ;;  %s2649_s1 = inlined_call_operand.hbm [shape: bf16[2,16,128], index: 1, kind: input, shape index: {}]   ;;  %s2650_s2 = inlined_call_operand.hbm [shape: bf16[2,16,128], index: 2, kind: input, shape index: {}]   ;;  %s2651_s3 = inlined_call_operand.hbm [shape: bf16[896,128], index: 3, kind: input, shape index: {}]   ;;  %s2652_s4 = inlined_call_operand.vmem [shape: f32[1,128], index: 4, kind: input, shape index: {}]   ;;  %s2653_s5 = inlined_call_operand.hbm [shape: bf16[128,128], index: 5, kind: input, shape index: {}]   ;;  %s2654_s6 = inlined_call_operand.hbm [shape: bf16[128,128], index: 6, kind: input, shape index: {}]   ;;  %s2655_s7 = inlined_call_operand.vmem [shape: f32[1,128], index: 7, kind: input, shape index: {}]   ;;  %s2656_s8 = inlined_call_operand.hbm [shape: f32[2,1,128], index: 8, kind: output, shape index: {}]  }
   0x1   :  { %2674 = sst [smem:[#allocation24_spill]] %s2649_s1 }
   0x2   :  { %2675 = sst [smem:[#allocation25_spill]] %s2651_s3 }
   0x3   :  { %2676 = sst [smem:[#allocation26_spill]] %s2653_s5 }
   0x4   :  { %2677 = sst [smem:[#allocation27_spill]] %s2654_s6 }
   0x5   :  { %13 = vsyncpa [#allocation3], 0 }
   0x6   :  { %15 = vsyncpa [#allocation3 + $0x1], 0 }
   0x7   :  { %16 = vsyncpa [#allocation6], 0 }
   0x8   :  { %18 = vsyncpa [#allocation6 + $0x1], 0 }
   0x9   :  { %19 = vsyncpa [#allocation9], 0 }
   0xa   :  { %20 = vsyncpa [#allocation12], 0 }
   0xb   :  { %21 = vsyncpa [#allocation4], 0 }
   0xc   :  { %23 = vsyncpa [#allocation4 + $0x1], 0  ;;  %s2275_s27 = smov 0   ;;  %s2277_s28 = smov 0  }
   0xd   :  { %s2279_s29 = smov 0   ;;  %s2281_s30 = smov 0  }
   0xe LB: > { %2678 = sst [smem:[#allocation19_spill]] %s2205_s27  ;;  %s2296_s9 = sadd.s32 4294967295, %s2217_s30   ;;  %s2217_s30 = sphi %s2281_s30, %s2713_s30   ;;  %s2213_s29 = sphi %s2279_s29, %s2717_s29   ;;  %s2209_s28 = sphi %s2277_s28, %s2716_s28   ;;  %s2205_s27 = sphi %s2275_s27, %s2715_s27  }
   0xf   : > { %2679 = sst [smem:[#allocation20_spill]] %s2217_s30  ;;  %s1546_s10 = sadd.s32 4294967294, %s2217_s30  }
  0x10   : > { %s2300_s11 = sadd.s32 1, %s2217_s30   ;;  %s36_s12 = sadd.s32 1, %s2213_s29 }
  0x11   : > { %2680 = sst [smem:[#allocation21_spill]] %s2300_s11  ;;  %s33_s13 = ssub.s32 %s2217_s30, %s2300_s11 }
  0x12   : > { %p43_p0 = scmp.ne.s32.totalorder %s2213_s29, %s2209_s28  ;;  %p34_p1 = scmp.eq.s32.totalorder %s33_s13, 0 }
  0x13   : > { %p44_p2 = scmp.eq.s32.totalorder %s2217_s30, 0  ;;  %p49_p3 = scmp.ne.s32.totalorder %s2209_s28, %s2205_s27 }
  0x14   : > { %p2657_p4 = scmp.eq.s32.totalorder %s2296_s9, 0  ;;  %p230_p7 = scmp.eq.s32.totalorder %s2296_s9, 1 }
  0x15   : > { %s2312_s14 = scalar_select %p34_p1, %s2213_s29, %s36_s12  }
  0x16   : > { %p2314_p5 = por %p44_p2, %p43_p0  ;;  %p2320_p6 = por %p2657_p4, %p49_p3 }
  0x17   : > { %2681 = sst [smem:[#allocation22_spill]] %s2312_s14  ;;  %p236_p8 = scmp.eq.s32.totalorder %s1546_s10, 1 }
  0x18   : > { %s2683_s16 = scalar_select %p2320_p6, 1, 0 }
  0x19   : > { %p1547_p9 = scmp.ge.s32.totalorder %s2217_s30, 1  ;;  %p243_p10 = scmp.lt.s32.totalorder %s2217_s30, 3 }
  0x1a   : > { %p2327_p11 = por %p230_p7, %p43_p0  ;;  %p2331_p12 = por %p236_p8, %p49_p3 }
  0x1b   : > { %p2335_p13 = pnand %p1547_p9, %p243_p10  ;;  %s2219_s20 = smov [#allocation8]  }
  0x1c   : > { %s2684_s17 = scalar_select %p2327_p11, 1, 0 }
  0x1d   : > { %s2685_s18 = scalar_select %p2331_p12, 1, 0 }
  0x1e   : > { %s2687_s19 = scalar_select %p2335_p13, 1, 0 }
  0x1f   : > { %2686 = sst [smem:[#allocation23_spill]] %s2685_s18  ;;  %p1832_p1 = pneg %p2335_p13 }
  0x20   : > { %s255_s21 = sshll.u32 %s2219_s20, 4  ;;  %p1859_p3 = scmp.lt.s32.totalorder %s2217_s30, 2  ;;  %s256_s21 = int_to_ptr.vmem [resolvable:$true] %s255_s21 }
  0x21   : > { %p2343_p2 = pnand %p1832_p1, %p2657_p4  ;;  %s2659_s23 = sand.u32 1, %s2213_s29  }
  0x22   : > { %s2352_s24 = sshll.u32 %s2659_s23, 3  ;;  %s1990_s25 = scalar_lea.vmem %s256_s21, 7168 }
  0x23   : > { %s2688_s22 = scalar_select %p2343_p2, 1, 0 }
  0x24   : > { %p2668_p7 = pneg %p2343_p2  ;;  %p1991_p8 = scmp.ne.s32.totalorder %s256_s21, %s1990_s25 }
  0x25   : > { %p1998_p1 = scmp.lt.s32.totalorder %s256_s21, %s256_s21  ;;  %p1999_p4 = scmp.lt.s32.totalorder %s1990_s25, %s1990_s25 }
  0x26   : > { %p1993_p9 = pnand %p1991_p8, %p2668_p7 }
  0x27   : > { %p2000_p12 = por %p1999_p4, %p1998_p1 }
  0x28   : > { %p1994_p10 = pneg %p1993_p9 }
  0x2a   : > { %p2001_p11 = pnand %p2000_p12, %p1994_p10 }
  0x2c   : > { %2004 = shalt.err (!%p2001_p11)
}
  0x2d   : > { %s2663_s26 = smov 64   ;;  %s2665_s10 = smov 4  }
  0x2e   : > { %s2689_s3 = sld [smem:[#allocation25_spill]]  ;;  %s2368_s20 = sshll.u32 %s2217_s30, 7 }
  0x2f   : > { %p2374_p4 = pnand %p1859_p3, %p2314_p5  ;;  %s322_s23 = sand.u32 1, %s2217_s30  }
  0x30   : > { %s2691_s1 = sld [smem:[#allocation24_spill]]  ;;  %s2388_s15 = scalar_lea.sflag [#allocation6], %s322_s23 }
  0x31   : > { %p2394_p11 = pneg %p2374_p4 }
  0x34   : > { %1835 = dma.hbm_to_vmem [thread:$0]  (!%p2343_p2), %s2689_s3, 7168, %s256_s21, [#allocation9], %s2663_s26, %s2663_s26, %s2665_s10  }
  0x35   : > { %s326_s21 = scalar_lea.vmem [#allocation5], %s2352_s24 }
  0x36   : > { %s2383_s18 = scalar_lea.hbm %s2691_s1, %s2368_s20  ;;  %s333_s12 = sshll.u32 %s326_s21, 4  ;;  %s2386_s12 = int_to_ptr.vmem [resolvable:$true] %s333_s12 }
  0x37   : > { %s2005_s13 = scalar_lea.hbm %s2383_s18, 128  ;;  %s2010_s10 = scalar_lea.hbm %s2691_s1, 256 }
  0x38   : > { %p2006_p5 = scmp.ne.s32.totalorder %s2383_s18, %s2005_s13  ;;  %p2011_p8 = scmp.lt.s32.totalorder %s2383_s18, %s2691_s1 }
  0x39   : > { %p2012_p9 = scmp.lt.s32.totalorder %s2010_s10, %s2005_s13 }
  0x3a   : > { %p2008_p12 = pnand %p2394_p11, %p2006_p5 }
  0x3b   : > { %p2013_p10 = por %p2012_p9, %p2011_p8 }
  0x3c   : > { %p2009_p3 = pneg %p2008_p12 }
  0x3e   : > { %p2014_p1 = pnand %p2013_p10, %p2009_p3 }
  0x40   : > { %2017 = shalt.err (!%p2014_p1)
}
  0x41   : > { %s2018_s23 = scalar_lea.vmem %s2386_s12, 128  ;;  %s2222_s30 = smov [#allocation5]  }
  0x42   : > { %p2019_p0 = scmp.ne.s32.totalorder %s2386_s12, %s2018_s23  ;;  %s2023_s11 = sshll.u32 %s2222_s30, 4  ;;  %s2024_s11 = int_to_ptr.vmem [resolvable:$false] %s2023_s11 }
  0x43   : > { %s2025_s14 = scalar_lea.vmem %s2024_s11, 256  ;;  %p2026_p7 = scmp.lt.s32.totalorder %s2386_s12, %s2024_s11 }
  0x44   : > { %p2021_p5 = pnand %p2019_p0, %p2394_p11  ;;  %p2027_p6 = scmp.lt.s32.totalorder %s2025_s14, %s2018_s23 }
  0x46   : > { %p2022_p12 = pneg %p2021_p5  ;;  %p2028_p13 = por %p2027_p6, %p2026_p7 }
  0x48   : > { %p2029_p2 = pnand %p2028_p13, %p2022_p12 }
  0x4a   : > { %2032 = shalt.err (!%p2029_p2)
}
  0x4b   : > { %s2693_s3 = smov 4   ;;  %s2694_s10 = smov 64  }
  0x4c   : > { %1848 = dma.hbm_to_vmem [thread:$0]  (!%p2374_p4), %s2383_s18, 128, %s2386_s12, %s2388_s15, %s2694_s10, %s2694_s10, %s2693_s3  }
  0x4d   : > { %s2223_s13 = smov [#allocation10]   ;;  %s2224_s30 = smov [#allocation11]  }
  0x4e   : > { %s271_s21 = sshll.u32 %s2223_s13, 4  ;;  %s284_s1 = sshll.u32 %s2224_s30, 4  ;;  %s272_s21 = int_to_ptr.vmem [resolvable:$true] %s271_s21  ;;  %s285_s1 = int_to_ptr.vmem [resolvable:$true] %s284_s1 }
  0x4f   : > { %s2044_s11 = scalar_lea.vmem %s272_s21, 1024  ;;  %p2695_p6 = scmp.ne.s32.totalorder %s2688_s22, 0 }
  0x50   : > { %p2045_p0 = scmp.ne.s32.totalorder %s272_s21, %s2044_s11  ;;  %p2052_p3 = scmp.lt.s32.totalorder %s272_s21, %s272_s21 }
  0x51   : > { %p2696_p13 = pneg %p2695_p6  ;;  %p2053_p8 = scmp.lt.s32.totalorder %s2044_s11, %s2044_s11 }
  0x53   : > { %p2047_p2 = pnand %p2045_p0, %p2696_p13  ;;  %p2054_p9 = por %p2053_p8, %p2052_p3 }
  0x55   : > { %p2048_p7 = pneg %p2047_p2 }
  0x57   : > { %p2055_p10 = pnand %p2054_p9, %p2048_p7 }
  0x59   : > { %2058 = shalt.err (!%p2055_p10)
}
  0x5a   : > { %s2697_s5 = sld [smem:[#allocation26_spill]]  ;;  %s2070_s23 = scalar_lea.vmem %s285_s1, 1024 }
  0x5b   : > { %p2071_p1 = scmp.ne.s32.totalorder %s285_s1, %s2070_s23  ;;  %p2698_p5 = pmov %p2696_p13 }
  0x5c   : > { %p2078_p13 = scmp.lt.s32.totalorder %s285_s1, %s285_s1  ;;  %p2079_p2 = scmp.lt.s32.totalorder %s2070_s23, %s2070_s23 }
  0x5d   : > { %p2073_p12 = pnand %p2071_p1, %p2698_p5 }
  0x5e   : > { %p2080_p7 = por %p2079_p2, %p2078_p13 }
  0x5f   : > { %p2074_p0 = pneg %p2073_p12 }
  0x60   : > { %1838 = dma.hbm_to_vmem [thread:$0]  (!%p2695_p6), %s2697_s5, 1024, %s272_s21, [#allocation9], %s2694_s10, %s2694_s10, %s2693_s3  }
  0x61   : > { %p2081_p3 = pnand %p2080_p7, %p2074_p0 }
  0x63   : > { %2084 = shalt.err (!%p2081_p3)
}
  0x64   : > { %s2699_s6 = sld [smem:[#allocation27_spill]]  ;;  %s2446_s11 = scalar_lea.hbm %s2648_s0, %s2368_s20 }
  0x65   : > { %s305_s22 = scalar_lea.vmem [#allocation2], %s2352_s24  ;;  %s2455_s14 = scalar_lea.hbm %s2650_s2, %s2368_s20 }
  0x66   : > { %s312_s18 = sshll.u32 %s305_s22, 4  ;;  %s2700_s13 = sand.u32 1, %s2213_s29   ;;  %s2449_s18 = int_to_ptr.vmem [resolvable:$true] %s312_s18 }
  0x67   : > { %s302_s5 = scalar_lea.sflag [#allocation3], %s2700_s13  ;;  %p2091_p10 = scmp.lt.s32.totalorder %s2446_s11, %s2648_s0 }
  0x6a   : > { %1841 = dma.hbm_to_vmem [thread:$0]  (!%p2695_p6), %s2699_s6, 1024, %s285_s1, [#allocation12], %s2694_s10, %s2694_s10, %s2693_s3  }
  0x6b   : > { %s2085_s1 = scalar_lea.hbm %s2446_s11, 128  ;;  %s2090_s6 = scalar_lea.hbm %s2648_s0, 256 }
  0x6c   : > { %p2086_p6 = scmp.ne.s32.totalorder %s2446_s11, %s2085_s1  ;;  %p2092_p1 = scmp.lt.s32.totalorder %s2090_s6, %s2085_s1 }
  0x6e   : > { %p2088_p8 = pnand %p2086_p6, %p2394_p11  ;;  %p2093_p5 = por %p2092_p1, %p2091_p10 }
  0x70   : > { %p2089_p9 = pneg %p2088_p8 }
  0x72   : > { %p2094_p12 = pnand %p2093_p5, %p2089_p9 }
  0x74   : > { %2097 = shalt.err (!%p2094_p12)
}
  0x75   : > { %s2098_s20 = scalar_lea.vmem %s2449_s18, 128  ;;  %s2225_s12 = smov [#allocation2]  }
  0x76   : > { %p2099_p0 = scmp.ne.s32.totalorder %s2449_s18, %s2098_s20  ;;  %s2103_s23 = sshll.u32 %s2225_s12, 4  ;;  %s2104_s23 = int_to_ptr.vmem [resolvable:$false] %s2103_s23 }
  0x77   : > { %s2105_s13 = scalar_lea.vmem %s2104_s23, 256  ;;  %p2106_p7 = scmp.lt.s32.totalorder %s2449_s18, %s2104_s23 }
  0x78   : > { %p2101_p13 = pnand %p2099_p0, %p2394_p11  ;;  %p2107_p3 = scmp.lt.s32.totalorder %s2105_s13, %s2098_s20 }
  0x7a   : > { %p2102_p2 = pneg %p2101_p13  ;;  %p2108_p6 = por %p2107_p3, %p2106_p7 }
  0x7c   : > { %p2109_p8 = pnand %p2108_p6, %p2102_p2 }
  0x7e   : > { %2112 = shalt.err (!%p2109_p8)
}
  0x7f   : > { %1845 = dma.hbm_to_vmem [thread:$0]  (!%p2374_p4), %s2446_s11, 128, %s2449_s18, %s302_s5, %s2694_s10, %s2694_s10, %s2693_s3  }
  0x80   : > { %s347_s6 = scalar_lea.vmem [#allocation7], %s2352_s24  ;;  %s2113_s1 = scalar_lea.hbm %s2455_s14, 128 }
  0x81   : > { %s354_s27 = sshll.u32 %s347_s6, 4  ;;  %p2114_p9 = scmp.ne.s32.totalorder %s2455_s14, %s2113_s1  ;;  %s355_s27 = int_to_ptr.vmem [resolvable:$true] %s354_s27 }
  0x82   : > { %s2118_s22 = scalar_lea.hbm %s2650_s2, 256  ;;  %p2119_p5 = scmp.lt.s32.totalorder %s2455_s14, %s2650_s2 }
  0x83   : > { %p2116_p10 = pnand %p2114_p9, %p2394_p11  ;;  %p2120_p12 = scmp.lt.s32.totalorder %s2118_s22, %s2113_s1 }
  0x85   : > { %p2117_p1 = pneg %p2116_p10  ;;  %p2121_p0 = por %p2120_p12, %p2119_p5 }
  0x87   : > { %p2122_p13 = pnand %p2121_p0, %p2117_p1 }
  0x89   : > { %2125 = shalt.err (!%p2122_p13)
}
  0x8a   : > { %s2126_s5 = scalar_lea.vmem %s355_s27, 128  ;;  %s2226_s24 = smov [#allocation7]  }
  0x8b   : > { %p2127_p2 = scmp.ne.s32.totalorder %s355_s27, %s2126_s5  ;;  %s2131_s11 = sshll.u32 %s2226_s24, 4  ;;  %s2132_s11 = int_to_ptr.vmem [resolvable:$false] %s2131_s11 }
  0x8c   : > { %s2133_s18 = scalar_lea.vmem %s2132_s11, 256  ;;  %p2134_p6 = scmp.lt.s32.totalorder %s355_s27, %s2132_s11 }
  0x8d   : > { %p2129_p7 = pnand %p2127_p2, %p2394_p11  ;;  %p2135_p8 = scmp.lt.s32.totalorder %s2133_s18, %s2126_s5 }
  0x8f   : > { %p2130_p3 = pneg %p2129_p7  ;;  %p2136_p9 = por %p2135_p8, %p2134_p6 }
  0x91   : > { %p2137_p10 = pnand %p2136_p9, %p2130_p3 }
  0x93   : > { %2140 = shalt.err (!%p2137_p10)
}
  0x94   : > { %1851 = dma.hbm_to_vmem [thread:$0]  (!%p2374_p4), %s2455_s14, 128, %s355_s27, %s2388_s15, %s2694_s10, %s2694_s10, %s2693_s3  }
  0x95   : > { %p2701_p11 = scmp.ne.s32.totalorder %s2687_s19, 0 }
  0x96   : > { %s2506_s26 = sand.u32 (!%p2701_p11), 1, %s2209_s28   ;;  %p2702_p1 = scmp.ne.s32.totalorder (!%p2701_p11), %s2683_s16, 0 }
  0x97   : > { %366 = sbr.rel (%p2701_p11) target bundleno = 709 (0x2c5), region = 52  ;;  %s2509_s23 = sshll.u32 (!%p2701_p11), %s2506_s26, 3 }
  0x98   : > { %s369_s13 = scalar_lea.sflag (!%p2701_p11), [#allocation3], %s2506_s26  ;;  %s372_s25 = scalar_lea.vmem (!%p2701_p11), [#allocation2], %s2509_s23 }
  0x9c   : > { %2184 = dma.done.wait (%p2702_p1), %s369_s13, 128  }
  0x9d   : > { %2186 = vsyncadd (%p2702_p1), %s369_s13, 4294967168  ;;  %s377_s19 = sand.u32 1, %s2296_s9   ;;  %s381_s3 = scalar_lea.vmem [#allocation5], %s2509_s23 }
  0x9e   : > { %s378_s15 = scalar_lea.sflag [#allocation6], %s377_s19 }
  0x9f   : > { %2188 = dma.done.wait (%p2702_p1), %s378_s15, 256  }
  0xa0   : > { %2190 = vsyncadd (%p2702_p1), %s378_s15, 4294967040  ;;  %s390_s10 = scalar_lea.vmem [#allocation7], %s2509_s23  ;;  %p2703_p4 = scmp.eq.s32.totalorder %s2296_s9, 0 }
  0xa2   : > { %2192 = dma.done.wait (%p2703_p4), [#allocation9], 8192   ;;  %p2704_p5 = pmov %p2703_p4 }
  0xa3   : > { %p2705_p12 = pmov %p2703_p4 }
  0xa4   : > { %2194 = vsyncadd (%p2704_p5), [#allocation9], 4294959104 }
  0xa5   : > { %2196 = dma.done.wait (%p2705_p12), [#allocation12], 1024   ;;  %p2706_p0 = pmov %p2703_p4 }
  0xa6   : > { %v1903_v0 = vld [vmem:[#allocation8 + $0x78] sm:$0xff]   ;;  %v1907_v4 = vld [vmem:[#allocation8 + $0x70] sm:$0xff]   ;;  %v1911_v8 = vld [vmem:[#allocation8 + $0x68] sm:$0xff]   ;;  %v463_v27 = vlaneseq  ;;  %v2227_v45 = vmov 0.0   ;;  %vm488_vm2 = vcmask 1041408   ;;  %vm509_vm8 = vcmask 1046528  }
  0xa7   : > { %2198 = vsyncadd (%p2706_p0), [#allocation12], 4294966272  ;;  %v1904_v1 = vld [vmem:[#allocation8 + $0xf8] sm:$0xff]   ;;  %1659 = vmatprep.subr.bf16.mxu0 %v1903_v0  ;;  %v1908_v5 = vld [vmem:[#allocation8 + $0xf0] sm:$0xff]   ;;  %vm489_vm3 = vsmask.f32 1280 }
  0xa8   : > { %v1905_v2 = vld [vmem:[#allocation8 + $0x38] sm:$0xff]   ;;  %1681 = vmatprep.subr.bf16.mxu1 %v1904_v1  ;;  %v1909_v6 = vld [vmem:[#allocation8 + $0x30] sm:$0xff]   ;;  %v1912_v9 = vld [vmem:[#allocation8 + $0xe8] sm:$0xff]   ;;  %v2532_v32 = vshrl.u32 %v463_v27, 7  ;;  %vm493_vm5 = vsmask.f32 7424 }
  0xa9   : > { %v1906_v3 = vld [vmem:[#allocation8 + $0xb8] sm:$0xff]   ;;  %1660 = vmatpush3.bf16.msra.mxu0 %v1905_v2  ;;  %v1910_v7 = vld [vmem:[#allocation8 + $0xb0] sm:$0xff]   ;;  %v1913_v10 = vld [vmem:[#allocation8 + $0x28] sm:$0xff]   ;;  %vm514_vm6 = vsmask.f32 6400  ;;  %vm2228_vm9 = vmmov 0  }
  0xaa   : > { %1682 = vmatpush3.bf16.msra.mxu1 %v1906_v3  ;;  %1661 = vmatprep.subr.bf16.mxu0 %v1907_v4  ;;  %v1914_v11 = vld [vmem:[#allocation8 + $0xa8] sm:$0xff]   ;;  %v1915_v12 = vld [vmem:[#allocation8 + $0x60] sm:$0xff]   ;;  %v1919_v16 = vld [vmem:[#allocation8 + $0x58] sm:$0xff]   ;;  %v2541_v44 = vadd.s32 8, %v2532_v32  ;;  %vm466_vm0 = vcmp.gt.s32.totalorder %v2532_v32, 0  ;;  %vm525_vm10 = vcmask 1045504  }
  0xab   : > { %1683 = vmatprep.subr.bf16.mxu1 %v1908_v5  ;;  %v1916_v13 = vld [vmem:[#allocation8 + $0xe0] sm:$0xff]   ;;  %v1920_v17 = vld [vmem:[#allocation8 + $0xd8] sm:$0xff]   ;;  %v1923_v20 = vld [vmem:[#allocation8 + $0x50] sm:$0xff]   ;;  %vm530_vm7 = vsmask.f32 5376  ;;  %vm539_vm11 = vcmask 1044480  }
  0xac   : > { %v1917_v14 = vld [vmem:[#allocation8 + $0x20] sm:$0xff]   ;;  %v1921_v18 = vld [vmem:[#allocation8 + $0x18] sm:$0xff]   ;;  %v1924_v21 = vld [vmem:[#allocation8 + $0xd0] sm:$0xff]   ;;  %vm469_vm1 = vcmp.lt.s32.totalorder %v2541_v44, 9  ;;  %s1641_s1 = sshll.u32 %s2296_s9, 4  ;;  %s443_s21 = scalar_lea.vmem [#allocation13], %s2506_s26 }
  0xad   : > { %1662 = vmatpush3.bf16.msra.mxu0 %v1909_v6  ;;  %v1918_v15 = vld [vmem:[#allocation8 + $0xa0] sm:$0xff]   ;;  %v1922_v19 = vld [vmem:[#allocation8 + $0x98] sm:$0xff]   ;;  %v1925_v22 = vld [vmem:[#allocation8 + $0x10] sm:$0xff]   ;;  %s1408_s30 = sshll.u32 %s443_s21, 4  ;;  %s1406_s12 = scalar_lea.hbm %s2656_s8, %s1641_s1  ;;  %s1409_s30 = int_to_ptr.vmem [resolvable:$true] %s1408_s30 }
  0xae   : > { %1684 = vmatpush3.bf16.msra.mxu1 %v1910_v7  ;;  %1663 = vmatprep.subr.bf16.mxu0 %v1911_v8  ;;  %v1926_v23 = vld [vmem:[#allocation8 + $0x90] sm:$0xff]   ;;  %v1927_v24 = vld [vmem:[#allocation8 + $0x48] sm:$0xff]   ;;  %v1931_v29 = vld [vmem:[#allocation8 + $0x40] sm:$0xff]   ;;  %s1396_s5 = scalar_lea.sflag [#allocation4], %s2506_s26  ;;  %s2141_s24 = scalar_lea.vmem %s1409_s30, 16 }
  0xaf   : > { %1685 = vmatprep.subr.bf16.mxu1 %v1912_v9  ;;  %v1928_v25 = vld [vmem:[#allocation8 + $0xc8] sm:$0xff]   ;;  %v1932_v30 = vld [vmem:[#allocation8 + $0xc0] sm:$0xff]   ;;  %v1648_v34 = vld [vmem:[%s372_s25] sm:$0xff]   ;;  %p2142_p13 = scmp.ne.s32.totalorder %s1409_s30, %s2141_s24  ;;  %p2707_p2 = scmp.ne.s32.totalorder %s2684_s17, 0 }
  0xb0   : > { %v1929_v26 = vld [vmem:[#allocation8 + $0x8] sm:$0xff]   ;;  %v1933_v31 = vld [vmem:[#allocation8] sm:$0xff]   ;;  %v1656_v36 = vld [vmem:[%s390_s10] sm:$0xff]   ;;  %v1649_v37 = vunpack.c.l.bf16 %v1648_v34  ;;  %v1650_v38 = vunpack.c.h.bf16 %v1648_v34  ;;  %s2229_s11 = smov [#allocation13]  }
  0xb1   : > { %1664 = vmatpush3.bf16.msra.mxu0 %v1913_v10  ;;  %v1930_v28 = vld [vmem:[#allocation8 + $0x88] sm:$0xff]   ;;  %v1934_v33 = vld [vmem:[#allocation8 + $0x80] sm:$0xff]   ;;  %v1935_v41 = vld [vmem:[#allocation8 + $0x178] sm:$0xff]   ;;  %v1657_v42 = vunpack.c.l.bf16 %v1656_v36  ;;  %v1658_v43 = vunpack.c.h.bf16 %v1656_v36  ;;  %p2143_p7 = pnand %p2142_p13, %p2707_p2  ;;  %s2145_s18 = sshll.u32 %s2229_s11, 4  ;;  %s2146_s18 = int_to_ptr.vmem [resolvable:$false] %s2145_s18 }
  0xb2   : > { %1686 = vmatpush3.bf16.msra.mxu1 %v1914_v11  ;;  %1665 = vmatprep.subr.bf16.mxu0 %v1915_v12  ;;  %v1652_v35 = vld [vmem:[%s381_s3] sm:$0xff]   ;;  %vm490_vm4 = vmand %vm488_vm2, %vm489_vm3  ;;  %v1936_v10 = vld [vmem:[#allocation8 + $0x138] sm:$0xff]   ;;  %s2147_s9 = scalar_lea.vmem %s2146_s18, 32  ;;  %p2148_p6 = scmp.lt.s32.totalorder %s1409_s30, %s2146_s18 }
  0xb3   : > { %1687 = vmatprep.subr.bf16.mxu1 %v1916_v13  ;;  %v1653_v39 = vunpack.c.l.bf16 %v1652_v35  ;;  %v1654_v40 = vunpack.c.h.bf16 %v1652_v35  ;;  %v1946_v34 = vld [vmem:[#allocation8 + $0x1a0] sm:$0xff]   ;;  %v1947_v35 = vld [vmem:[#allocation8 + $0x158] sm:$0xff]   ;;  %v1384_v44 = vld [vmem:[%s2655_s7] sm:$0x1]  ;;  %p2144_p3 = pneg %p2143_p7  ;;  %p2149_p8 = scmp.lt.s32.totalorder %s2147_s9, %s2141_s24 }
  0xb4   : > { %v1948_v36 = vld [vmem:[#allocation8 + $0x118] sm:$0xff]  }
  0xb5   : > { %1666 = vmatpush3.bf16.msra.mxu0 %v1917_v14  ;;  %v453_v46 = vadd.f32 %v1653_v39, %v1649_v37  ;;  %v454_v47 = vadd.f32 %v1654_v40, %v1650_v38  ;;  %v1937_v14 = vld [vmem:[#allocation8 + $0x1b8] sm:$0xff]   ;;  %v1950_v38 = vld [vmem:[#allocation8 + $0x150] sm:$0xff]   ;;  %p2150_p9 = por %p2149_p8, %p2148_p6 }
  0xb6   : > { %1688 = vmatpush3.bf16.msra.mxu1 %v1918_v15  ;;  %1667 = vmatprep.subr.bf16.mxu0 %v1919_v16  ;;  %v1949_v37 = vld [vmem:[#allocation8 + $0x198] sm:$0xff]   ;;  %v1951_v39 = vld [vmem:[#allocation8 + $0x110] sm:$0xff]  }
  0xb7   : > { %1689 = vmatprep.subr.bf16.mxu1 %v1920_v17  ;;  %v459_v48 = vadd.f32 %v1657_v42, %v453_v46  ;;  %v460_v49 = vadd.f32 %v1658_v43, %v454_v47  ;;  %v1952_v40 = vld [vmem:[#allocation8 + $0x190] sm:$0xff]   ;;  %v1954_v42 = vld [vmem:[#allocation8 + $0x108] sm:$0xff]   ;;  %v1956_v46 = vld [vmem:[#allocation8 + $0x140] sm:$0xff]   ;;  %p2151_p10 = pnand %p2150_p9, %p2144_p3 }
  0xb8   : > { %v1955_v43 = vld [vmem:[#allocation8 + $0x188] sm:$0xff]   ;;  %v1957_v47 = vld [vmem:[#allocation8 + $0x100] sm:$0xff]  }
  0xb9   : > { %1668 = vmatpush3.bf16.msra.mxu0 %v1921_v18  ;;  %v2546_v50 = vmul.f32 0.33333334, %v459_v48  ;;  %v462_v51 = vmul.f32 0.33333334, %v460_v49  ;;  %v1938_v18 = vld [vmem:[#allocation8 + $0x170] sm:$0xff]  }
  0xba   : > { %1690 = vmatpush3.bf16.msra.mxu1 %v1922_v19  ;;  %1669 = vmatprep.subr.bf16.mxu0 %v1923_v20 }
  0xbb   : > { %1691 = vmatprep.subr.bf16.mxu1 %v1924_v21  ;;  %v476_v52 = vsel %vm466_vm0, %v2546_v50, 0.0  ;;  %v477_v53 = vsel %vm469_vm1, %v462_v51, 0.0  ;;  %v1958_v51 = vld [vmem:[#allocation8 + $0x180] sm:$0xff]  }
  0xbc   : > { %v478_v54 = vpack.c.bf16 %v477_v53, %v476_v52 }
  0xbd   : > { %1670 = vmatpush3.bf16.msra.mxu0 %v1925_v22  ;;  %v1939_v22 = vld [vmem:[#allocation8 + $0x130] sm:$0xff]  }
  0xbe   : > { %1692 = vmatpush3.bf16.msra.mxu1 %v1926_v23  ;;  %1671 = vmatprep.subr.bf16.mxu0 %v1927_v24  ;;  %v480_v55 = vshrl.u32 %v478_v54, 16  ;;  %v483_v56 = vshll.u32 %v478_v54, 16  ;;  %v1940_v23 = vld [vmem:[#allocation8 + $0x1b0] sm:$0xff]  }
  0xbf   : > { %1693 = vmatprep.subr.bf16.mxu1 %v1928_v25 }
  0xc0   : > { %v482_v57 = vrot.slane %v480_v55, 6  ;;  %v485_v58 = vrot.slane %v483_v56, 7  ;;  %v1959_v56 = vld [vmem:[#allocation10 + $0x38] sm:$0xff]  }
  0xc1   : > { %1672 = vmatpush3.bf16.msra.mxu0 %v1929_v26  ;;  %v1941_v26 = vld [vmem:[#allocation8 + $0x168] sm:$0xff]  }
  0xc2   : > { %1694 = vmatpush3.bf16.msra.mxu1 %v1930_v28  ;;  %1673 = vmatprep.subr.bf16.mxu0 %v1931_v29  ;;  %v486_v59 = vor.u32 %v485_v58, %v482_v57  ;;  %v1942_v28 = vld [vmem:[#allocation8 + $0x128] sm:$0xff]   ;;  %v1960_v57 = vld [vmem:[#allocation10 + $0x30] sm:$0xff]   ;;  %v1961_v58 = vld [vmem:[#allocation11 + $0x38] sm:$0xff]  }
  0xc3   : > { %1695 = vmatprep.subr.bf16.mxu1 %v1932_v30  ;;  %v1943_v29 = vld [vmem:[#allocation8 + $0x1a8] sm:$0xff]   ;;  %v1944_v30 = vld [vmem:[#allocation8 + $0x160] sm:$0xff]  }
  0xc4   : > { %v2553_v60 = vsel %vm490_vm4, 0, %v486_v59  ;;  %v2555_v61 = vsel %vm490_vm4, %v486_v59, 0  ;;  %v1962_v59 = vld [vmem:[#allocation10 + $0x28] sm:$0xff]  }
  0xc5   : > { %1674 = vmatpush3.bf16.msra.mxu0 %v1933_v31  ;;  %v495_v62 = vshrl.u32 %v2553_v60, 16  ;;  %v497_v63 = vshll.u32 %v2553_v60, 16  ;;  %v502_v0 = vshll.u32 %v2555_v61, 16  ;;  %v518_v1 = vshrl.u32 %v2555_v61, 16 }
  0xc6   : > { %1696 = vmatpush3.bf16.msra.mxu1 %v1934_v33  ;;  %1703 = vmatprep.subr.bf16.mxu0 %v1935_v41  ;;  %v510_v2 = vrot.slane %v2553_v60, 1  ;;  %v511_v3 = vrot.slane %v2555_v61, 1  ;;  %v1945_v33 = vld [vmem:[#allocation8 + $0x120] sm:$0xff]   ;;  %v1953_v41 = vld [vmem:[#allocation8 + $0x148] sm:$0xff]   ;;  %v526_v48 = vrot.slane %v2553_v60, 2  ;;  %v527_v49 = vrot.slane %v2555_v61, 2 }
  0xc7   : > { %1752 = vmatprep.subr.bf16.mxu1 %v2227_v45  ;;  %v499_v4 = vrot.slane %v497_v63, 1  ;;  %v504_v5 = vrot.slane %v502_v0, 1  ;;  %v515_v6 = vrot.slane %v495_v62, 1  ;;  %v516_v7 = vrot.slane %v497_v63, 2 }
  0xc8   : > { %v520_v8 = vrot.slane %v518_v1, 1  ;;  %v521_v9 = vrot.slane %v502_v0, 2  ;;  %v531_v15 = vrot.slane %v495_v62, 2  ;;  %v512_v17 = vsel %vm509_vm8, %v510_v2, %v511_v3  ;;  %v1969_v2 = vld [vmem:[#allocation11 + $0x18] sm:$0xff]   ;;  %v1970_v3 = vld [vmem:[#allocation10 + $0x8] sm:$0xff]  }
  0xc9   : > { %v500_v11 = vor.u32 %v499_v4, %v495_v62  ;;  %v517_v12 = vor.u32 %v516_v7, %v515_v6  ;;  %v532_v19 = vrot.slane %v497_v63, 3  ;;  %v534_v21 = vrot.slane %v518_v1, 2  ;;  %v1965_v62 = vld [vmem:[#allocation11 + $0x28] sm:$0xff]   ;;  %v1966_v63 = vld [vmem:[#allocation10 + $0x18] sm:$0xff]   ;;  %v1968_v1 = vld [vmem:[#allocation10 + $0x10] sm:$0xff]  }
  0xca   : > { %v522_v13 = vor.u32 %v521_v9, %v520_v8  ;;  %v535_v25 = vrot.slane %v502_v0, 3  ;;  %v540_v52 = vrot.slane %v2553_v60, 3  ;;  %v541_v53 = vrot.slane %v2555_v61, 3  ;;  %v1964_v61 = vld [vmem:[#allocation10 + $0x20] sm:$0xff]   ;;  %v1971_v4 = vld [vmem:[#allocation11 + $0x10] sm:$0xff]   ;;  %v1973_v6 = vld [vmem:[#allocation11 + $0x8] sm:$0xff]  }
  0xcb   : > { %v505_v16 = vsel %vm493_vm5, %v500_v11, %v504_v5  ;;  %v533_v24 = vor.u32 %v532_v19, %v531_v15  ;;  %v528_v54 = vsel %vm525_vm10, %v526_v48, %v527_v49  ;;  %v1967_v0 = vld [vmem:[#allocation11 + $0x20] sm:$0xff]   ;;  %v1174_v7 = vpack.c.bf16 %v2546_v50, %v2546_v50 }
  0xcc   : > { %1031 = vmatprep.mubr.bf16.mxu0 %v505_v16  ;;  %v523_v20 = vsel %vm514_vm6, %v517_v12, %v522_v13  ;;  %v536_v27 = vor.u32 %v535_v25, %v534_v21  ;;  %v542_v55 = vsel %vm539_vm11, %v540_v52, %v541_v53  ;;  %v1972_v5 = vld [vmem:[#allocation10] sm:$0xff]   ;;  %v1568_v16 = vld [vmem:[%s2652_s4] ss:$0 sm:$0xff] }
  0xcd   : > { %1032 = vmatmul.mubr.bf16.vlgmr.msra.gmra.mxu0 %v2553_v60  ;;  %1072 = vmatprep.mubr.bf16.mxu1 %v523_v20  ;;  %v1963_v60 = vld [vmem:[#allocation11 + $0x30] sm:$0xff]   ;;  %v1974_v8 = vld [vmem:[#allocation11] sm:$0xff]  }
  0xce   : > { %1073 = vmatmul.mubr.bf16.vlgmr.msra.gmra.mxu1 %v512_v17  ;;  %1704 = vmatpush3.bf16.msra.mxu0 %v1936_v10  ;;  %v537_v31 = vsel %vm530_vm7, %v533_v24, %v536_v27 }
  0xcf   : > { %1753 = vmatpush3.bf16.msra.mxu1 %v1937_v14  ;;  %1705 = vmatprep.subr.bf16.mxu0 %v1938_v18 }
  0xd0   : > { %1754 = vmatprep.subr.bf16.mxu1 %v2227_v45  ;;  %1768 = vmatprep.mubr.msk.bf16.mxu1 %vm2228_vm9, %v2227_v45 }
  0xd1   : > { %1113 = vmatprep.mubr.bf16.mxu0 %v537_v31 }
  0xd2   : > { %1706 = vmatpush3.bf16.msra.mxu0 %v1939_v22 }
  0xd3   : > { %1755 = vmatpush3.bf16.msra.mxu1 %v1940_v23  ;;  %1707 = vmatprep.subr.bf16.mxu0 %v1941_v26 }
  0xd4   : > { %1756 = vmatprep.subr.bf16.mxu1 %v2227_v45 }
  0xd6   : > { %1708 = vmatpush3.bf16.msra.mxu0 %v1942_v28 }
  0xd7   : > { %1757 = vmatpush3.bf16.msra.mxu1 %v1943_v29  ;;  %1709 = vmatprep.subr.bf16.mxu0 %v1944_v30 }
  0xd8   : > { %1758 = vmatprep.subr.bf16.mxu1 %v2227_v45 }
  0xda   : > { %1710 = vmatpush3.bf16.msra.mxu0 %v1945_v33 }
  0xdb   : > { %1759 = vmatpush3.bf16.msra.mxu1 %v1946_v34  ;;  %1711 = vmatprep.subr.bf16.mxu0 %v1947_v35 }
  0xdc   : > { %1760 = vmatprep.subr.bf16.mxu1 %v2227_v45 }
  0xde   : > { %1712 = vmatpush3.bf16.msra.mxu0 %v1948_v36 }
  0xdf   : > { %1761 = vmatpush3.bf16.msra.mxu1 %v1949_v37  ;;  %1713 = vmatprep.subr.bf16.mxu0 %v1950_v38 }
  0xe0   : > { %1762 = vmatprep.subr.bf16.mxu1 %v2227_v45 }
  0xe2   : > { %1714 = vmatpush3.bf16.msra.mxu0 %v1951_v39 }
  0xe3   : > { %1763 = vmatpush3.bf16.msra.mxu1 %v1952_v40  ;;  %1715 = vmatprep.subr.bf16.mxu0 %v1953_v41 }
  0xe4   : > { %1764 = vmatprep.subr.bf16.mxu1 %v2227_v45 }
  0xe6   : > { %1716 = vmatpush3.bf16.msra.mxu0 %v1954_v42 }
  0xe7   : > { %1765 = vmatpush3.bf16.msra.mxu1 %v1955_v43  ;;  %1717 = vmatprep.subr.bf16.mxu0 %v1956_v46 }
  0xe8   : > { %1766 = vmatprep.subr.bf16.mxu1 %v2227_v45 }
  0xea   : > { %1718 = vmatpush3.bf16.msra.mxu0 %v1957_v47 }
  0xeb   : > { %1767 = vmatpush3.bf16.msra.mxu1 %v1958_v51  ;;  %1772 = vmatprep.subr.bf16.mxu0 %v2227_v45 }
  0xec   : > { %1792 = vmatprep.subr.bf16.mxu1 %v2227_v45 }
  0xed   : > { %1114 = vmatmul.mubr.bf16.vlgmr.msra.gmra.mxu0 %v528_v54 }
  0xee   : > { %1769 = vmatmul.mubr.bf16.vlgmr.msra.gmra.mxu1 %v542_v55  ;;  %1788 = vmatprep.mubr.msk.bf16.mxu0 %vm2228_vm9, %v2227_v45 }
  0xef   : > { %1808 = vmatprep.mubr.msk.bf16.mxu1 %vm2228_vm9, %v2227_v45  ;;  %1793 = vmatpush3.bf16.msra.mxu1 %v1959_v56 }
  0xf0   : > { %1794 = vmatprep.subr.bf16.mxu1 %v2227_v45  ;;  %1773 = vmatpush3.bf16.msra.mxu0 %v1961_v58 }
  0xf1   : > { %1774 = vmatprep.subr.bf16.mxu0 %v2227_v45 }
  0xf3   : > { %1795 = vmatpush3.bf16.msra.mxu1 %v1960_v57 }
  0xf4   : > { %1796 = vmatprep.subr.bf16.mxu1 %v2227_v45  ;;  %1775 = vmatpush3.bf16.msra.mxu0 %v1963_v60 }
  0xf5   : > { %1776 = vmatprep.subr.bf16.mxu0 %v2227_v45 }
  0xf7   : > { %1797 = vmatpush3.bf16.msra.mxu1 %v1962_v59 }
  0xf8   : > { %1798 = vmatprep.subr.bf16.mxu1 %v2227_v45  ;;  %1777 = vmatpush3.bf16.msra.mxu0 %v1965_v62 }
  0xf9   : > { %1778 = vmatprep.subr.bf16.mxu0 %v2227_v45 }
  0xfb   : > { %1799 = vmatpush3.bf16.msra.mxu1 %v1964_v61 }
  0xfc   : > { %1800 = vmatprep.subr.bf16.mxu1 %v2227_v45  ;;  %1779 = vmatpush3.bf16.msra.mxu0 %v1967_v0 }
  0xfd   : > { %1780 = vmatprep.subr.bf16.mxu0 %v2227_v45 }
  0xff   : > { %1801 = vmatpush3.bf16.msra.mxu1 %v1966_v63 }
 0x100   : > { %1802 = vmatprep.subr.bf16.mxu1 %v2227_v45  ;;  %1781 = vmatpush3.bf16.msra.mxu0 %v1969_v2 }
 0x101   : > { %1782 = vmatprep.subr.bf16.mxu0 %v2227_v45 }
 0x103   : > { %1803 = vmatpush3.bf16.msra.mxu1 %v1968_v1 }
 0x104   : > { %1804 = vmatprep.subr.bf16.mxu1 %v2227_v45  ;;  %1783 = vmatpush3.bf16.msra.mxu0 %v1971_v4 }
 0x105   : > { %1784 = vmatprep.subr.bf16.mxu0 %v2227_v45 }
 0x107   : > { %1805 = vmatpush3.bf16.msra.mxu1 %v1970_v3 }
 0x108   : > { %1806 = vmatprep.subr.bf16.mxu1 %v2227_v45  ;;  %1785 = vmatpush3.bf16.msra.mxu0 %v1973_v6 }
 0x109   : > { %1786 = vmatprep.subr.bf16.mxu0 %v2227_v45 }
 0x10b   : > { %1807 = vmatpush3.bf16.msra.mxu1 %v1972_v5 }
 0x10c   : > { %1787 = vmatpush3.bf16.msra.mxu0 %v1974_v8 }
 0x10e   : > { %1809 = vmatmul.mubr.bf16.vlgmr.msra.gmra.mxu1 %v1174_v7 }
 0x18d   : > { %v1675_v9 = vpop.f32.mrf.mxu0 }
 0x18e   : > { %v1697_v10 = vpop.f32.mrf.mxu1 }
 0x18f   : > { %v1676_v11 = vpop.f32.mrf.mxu0 }
 0x190   : > { %v1698_v12 = vpop.f32.mrf.mxu1  ;;  %v1677_v14 = vadd.f32 %v1676_v11, %v1675_v9 }
 0x191   : > { %v1678_v13 = vpop.f32.mrf.mxu0  ;;  %v1699_v18 = vadd.f32 %v1698_v12, %v1697_v10 }
 0x192   : > { %v1700_v15 = vpop.f32.mrf.mxu1  ;;  %v1034_v50 = vadd.f32 %v1677_v14, %v1568_v16 }
 0x193   : > { %v1679_v17 = vpop.f32.mrf.mxu0 }
 0x194   : > { %v1680_v19 = vadd.f32 %v1679_v17, %v1678_v13  ;;  %v1701_v20 = vpop.f32.mrf.mxu1  ;;  %v1075_v23 = vadd.f32 %v1699_v18, %v1034_v50 }
 0x195   : > { %v1702_v25 = vadd.f32 %v1701_v20, %v1700_v15 }
 0x196   : > { %v1037_v24 = vadd.f32 %v1680_v19, %v1568_v16 }
 0x198   : > { %v1078_v33 = vadd.f32 %v1702_v25, %v1037_v24 }
 0x1ad   : > { %v1719_v21 = vpop.f32.mrf.mxu0 }
 0x1ae   : > { %v1156_v22 = vpop.f32.mrf.mxu1 }
 0x1af   : > { %v1720_v45 = vpop.f32.mrf.mxu0 }
 0x1b0   : > { %v1721_v26 = vadd.f32 %v1720_v45, %v1719_v21  ;;  %v1770_v27 = vpop.f32.mrf.mxu1 }
 0x1b1   : > { %v1722_v28 = vpop.f32.mrf.mxu0 }
 0x1b2   : > { %v1116_v29 = vadd.f32 %v1721_v26, %v1075_v23  ;;  %v1159_v30 = vpop.f32.mrf.mxu1 }
 0x1b3   : > { %v1723_v31 = vpop.f32.mrf.mxu0 }
 0x1b4   : > { %v1157_v34 = vadd.f32 %v1156_v22, %v1116_v29  ;;  %v1724_v35 = vadd.f32 %v1723_v31, %v1722_v28  ;;  %v1771_v36 = vpop.f32.mrf.mxu1 }
 0x1b6   : > { %v1119_v37 = vadd.f32 %v1724_v35, %v1078_v33  ;;  %v1163_v38 = vmax.f32 %v1157_v34, 0.0 }
 0x1b8   : > { %v1160_v39 = vadd.f32 %v1159_v30, %v1119_v37  ;;  %v1165_v41 = vsel %vm466_vm0, %v1163_v38, 0.0 }
 0x1ba   : > { %v1164_v40 = vmax.f32 %v1160_v39, 0.0 }
 0x1bc   : > { %v1166_v42 = vsel %vm469_vm1, %v1164_v40, 0.0 }
 0x1bd   : > { %v1167_v43 = vmax.f32 %v1165_v41, %v1166_v42 }
 0x1bf   : > { %v1168_v46 = vrot.slane %v1167_v43, 4 }
 0x1c1   : > { %v1169_v47 = vmax.f32 %v1167_v43, %v1168_v46 }
 0x1c3   : > { %v1170_v48 = vrot.slane %v1169_v47, 2 }
 0x1c5   : > { %v1171_v49 = vmax.f32 %v1169_v47, %v1170_v48 }
 0x1c7   : > { %v1172_v51 = vrot.slane %v1171_v49, 1 }
 0x1c9   : > { %v1173_v52 = vmax.f32 %v1171_v49, %v1172_v51 }
 0x1cb   : > { %v1191_v53 = vpack.c.bf16 %v1173_v52, %v1173_v52 }
 0x1cd   : > { %1789 = vmatmul.mubr.bf16.vlgmr.msra.gmra.mxu0 %v1191_v53 }
 0x1ce   : > { %v1378_v54 = vpop.f32.mrf.mxu1 }
 0x1d0   : > { %v1810_v55 = vpop.f32.mrf.mxu1 }
 0x1d2   : > { %v1381_v56 = vpop.f32.mrf.mxu1 }
 0x1d4   : > { %v1811_v57 = vpop.f32.mrf.mxu1 }
 0x28d   : > { %v1290_v32 = vpop.f32.mrf.mxu0 }
 0x28e   : > { %v1379_v58 = vadd.f32 %v1378_v54, %v1290_v32 }
 0x28f   : > { %v1790_v59 = vpop.f32.mrf.mxu0 }
 0x290   : > { %v1385_v60 = vadd.f32 %v1384_v44, %v1379_v58 }
 0x291   : > { %v1293_v61 = vpop.f32.mrf.mxu0 }
 0x292   : > { %v1386_v62 = vsub.f32 0.0, %v1385_v60 }
 0x293   : > { %v1791_v63 = vpop.f32.mrf.mxu0 }
 0x294   : > { %v1387_v0 = vmul.f32 1.442695, %v1386_v62 }
 0x296   : > { %1975 = vpow2.f32 %v1387_v0 }
 0x2a3   : > { %v1976_v1 = vpop.eup %1975 }
 0x2a4   : > { %v1389_v2 = vadd.f32 1.0, %v1976_v1 }
 0x2a6   : > { %1977 = vrcp.f32 %v1389_v2 }
 0x2b3   : > { %v1978_v3 = vpop.eup %1977 }
 0x2b4   : > { %v1392_v4 = vmax.f32 %v1978_v3, 1e-07 }
 0x2b6   : > { %v1393_v5 = vmin.f32 %v1392_v4, 0.9999999 }
 0x2b8   : > { %1394 = vst [vmem:[%s443_s21] sm:$0x1] %v1393_v5 }
 0x2b9   : > { %2154 = shalt.err (!%p2151_p10)
}
 0x2ba   : > { %s2155_s23 = scalar_lea.hbm %s1406_s12, 16  ;;  %s2159_s25 = scalar_lea.hbm %s2656_s8, 32 }
 0x2bb   : > { %p2156_p11 = scmp.ne.s32.totalorder %s1406_s12, %s2155_s23  ;;  %p2160_p5 = scmp.lt.s32.totalorder %s1406_s12, %s2656_s8 }
 0x2bc   : > { %p2161_p12 = scmp.lt.s32.totalorder %s2159_s25, %s2155_s23 }
 0x2bd   : > { %p2157_p1 = pnand %p2156_p11, %p2707_p2 }
 0x2be   : > { %p2162_p0 = por %p2161_p12, %p2160_p5 }
 0x2bf   : > { %p2158_p4 = pneg %p2157_p1 }
 0x2c1   : > { %p2163_p13 = pnand %p2162_p0, %p2158_p4 }
 0x2c3   : > { %2166 = shalt.err (!%p2163_p13)
}
 0x2c4   : > { %1830 = dma.vmem_to_hbm [thread:$0]  (%p2707_p2), %s1409_s30, 16, %s1406_s12, %s1396_s5  }
 0x2c5 PF: > { %s2708_s3 = sld [smem:[#allocation19_spill]] }
 0x2c6   : > { %s2709_s10 = sld [smem:[#allocation23_spill]] }
 0x2c7   : > { %s2710_s16 = sld [smem:[#allocation20_spill]] }
 0x2cb   : > { %s1420_s14 = sand.u32 1, %s2708_s3  }
 0x2cc   : > { %p2711_p7 = scmp.ne.s32.totalorder %s2709_s10, 0  ;;  %s1421_s6 = scalar_lea.sflag [#allocation4], %s1420_s14 }
 0x2cd   : > { %p2712_p3 = scmp.ge.s32.totalorder %s2710_s16, 2 }
 0x2cf   : > { %p1853_p6 = pnand %p2712_p3, %p2711_p7 }
 0x2d1   : > { %p1854_p8 = pneg %p1853_p6 }
 0x2d3   : > { %2200 = dma.done.wait (%p1854_p8), %s1421_s6, 16  }
 0x2d4   : > { %2202 = vsyncadd (%p1854_p8), %s1421_s6, 4294967280  ;;  %s2713_s30 = sld [smem:[#allocation21_spill]]  ;;  %s2715_s27 = smov %s2209_s28 }
 0x2d5   : > { %s2714_s1 = sld [smem:[#allocation22_spill]]  ;;  %s2716_s28 = smov %s2213_s29 }
 0x2da   : > { %p26_p9 = scmp.ge.s32.totalorder %s2713_s30, 4  }
 0x2db   : > { %s2717_s29 = smov %s2714_s1 }
 0x2dc   :  { %28 = sbr.rel (!%p26_p9) target bundleno = 14 (0xe), region = 133 }
 0x2e1   :  { %1425 = vsyncpa [#allocation3], 1 }
 0x2e2   :  { %1427 = vsyncpa [#allocation3 + $0x1], 1 }
 0x2e3   :  { %1428 = vsyncpa [#allocation6], 1 }
 0x2e4   :  { %1430 = vsyncpa [#allocation6 + $0x1], 1 }
 0x2e5   :  { %1431 = vsyncpa [#allocation9], 1 }
 0x2e6   :  { %1432 = vsyncpa [#allocation12], 1 }
 0x2e7   :  { %1433 = vsyncpa [#allocation4], 1 }
 0x2e8   :  { %1435 = vsyncpa [#allocation4 + $0x1], 1 }

</bundles_post_ra>
